<compile_context>
chip_gen: v7x
topology: tpu7x:2x2x1
jax: 0.10.0
libtpu: 0.0.40
codegen_flags: <defaults>
</compile_context>

<pallas_src>
import functools

import jax
import jax.numpy as jnp
from jax.experimental import pallas as pl
from jax.experimental.pallas import tpu as pltpu

LANE = 128
SUBLANE = 8


def _round_up(x, m):
    return ((x + m - 1) // m) * m


def _fused_gcn_kernel(num_layers, output_dim, apply_log_softmax, compute_dtype,
                      *refs):
    """All GCN layers fused; one grid step processes a group of G boards.

    refs layout:
      refs[0]            a_ref      (G, N, N)       normalized adjacency (compute dtype)
      refs[1]            x_ref      (G, N, F_IN)    node features (compute dtype)
      refs[2 : 2+L]      w_refs[i]  (K_i, F_i)      per-layer zero-padded weights (compute dtype)
      refs[2+L : 1+2L]   scale_refs (1, F_i)        folded BN scale (f32), hidden layers only
      refs[1+2L : 1+3L]  shift_refs (1, F_i)        folded bias + BN shift (f32)
      refs[1+3L]         o_ref      (G, N, OUT_PAD) f32 output (lane-dense store)
    """
    L = num_layers
    a_ref, x_ref = refs[0], refs[1]
    w_refs = refs[2:2 + L]
    scale_refs = refs[2 + L:1 + 2 * L]
    shift_refs = refs[1 + 2 * L:1 + 3 * L]
    o_ref = refs[1 + 3 * L]

    g, n, f_in = x_ref.shape
    a = a_ref[...]                              # (G, N, N), compute dtype
    h = x_ref[...].reshape(g * n, f_in)         # layer-0 lhs is already compute dtype
    for i in range(L):
        lhs = h if i == 0 else h.astype(compute_dtype)
        # Node-feature transform: all boards stacked -> fills the MXU M dim.
        xw = jnp.dot(lhs, w_refs[i][...], preferred_element_type=jnp.float32)
        f_out = xw.shape[-1]
        # Per-board message passing A_hat @ (X W), f32 accumulation.
        h = jnp.einsum('gij,gjf->gif', a,
                       xw.astype(compute_dtype).reshape(g, n, f_out),
                       preferred_element_type=jnp.float32).reshape(g * n, f_out)
        if i < L - 1:
            # Folded bias + eval-mode BatchNorm1d, then ReLU (f32 epilogue).
            # Dropout with training=False is identity.
            h = jnp.maximum(h * scale_refs[i][...] + shift_refs[i][...], 0.0)
        else:
            h = h + shift_refs[i][...]          # final layer: bias only
    if apply_log_softmax:
        # LogSoftmax over the valid feature columns only (rest are padding).
        col = jax.lax.broadcasted_iota(jnp.int32, h.shape, 1)
        valid = col < output_dim
        hm = jnp.where(valid, h, jnp.float32(-1e30))
        m = jnp.max(hm, axis=-1, keepdims=True)
        z = hm - m
        lse = jnp.log(jnp.sum(jnp.exp(z), axis=-1, keepdims=True))
        h = jnp.where(valid, z - lse, 0.0)
    o_ref[...] = h.reshape(g, n, -1)


def gcn_forward_fused(a_hat, x, w_list, scale_list, shift_list, *,
                      output_dim, apply_log_softmax, compute_dtype,
                      boards_per_step):
    """a_hat: (B, N, N), x: (B, N, F_IN_PAD). Returns (B, N, OUT_PAD) f32."""
    b, n, f_in = x.shape
    num_layers = len(w_list)
    out_pad = w_list[-1].shape[-1]
    g = boards_per_step
    assert b % g == 0, "batch must be divisible by boards_per_step"

    kernel = functools.partial(_fused_gcn_kernel, num_layers, output_dim,
                               apply_log_softmax, compute_dtype)

    in_specs = [
        pl.BlockSpec((g, n, n), lambda i: (i, 0, 0)),       # adjacency group
        pl.BlockSpec((g, n, f_in), lambda i: (i, 0, 0)),    # feature group
    ]
    # Weights / scales / shifts: constant index_map -> DMA'd once, stay resident.
    for arr in list(w_list) + list(scale_list) + list(shift_list):
        in_specs.append(pl.BlockSpec(arr.shape, lambda i: (0, 0)))
    out_specs = pl.BlockSpec((g, n, out_pad), lambda i: (i, 0, 0))

    # Advisory cost estimate (compute-dtype byte counts).
    itemsize = jnp.dtype(compute_dtype).itemsize
    flops = 0
    for w in w_list:
        k, f = w.shape
        flops += 2 * b * n * k * f      # X @ W
        flops += 2 * b * n * n * f      # A_hat @ (X W)
    transcendentals = b * n * out_pad if apply_log_softmax else 0
    bytes_accessed = ((a_hat.size + x.size + sum(int(w.size) for w in w_list)) * itemsize
                      + sum(int(s.size) for s in scale_list) * 4
                      + sum(int(s.size) for s in shift_list) * 4
                      + b * n * out_pad * 4)

    return pl.pallas_call(
        kernel,
        out_shape=jax.ShapeDtypeStruct((b, n, out_pad), jnp.float32),
        grid_spec=pltpu.PrefetchScalarGridSpec(
            num_scalar_prefetch=0,
            grid=(b // g,),
            in_specs=in_specs,
            out_specs=out_specs),
        compiler_params=pltpu.CompilerParams(
            dimension_semantics=("parallel",),
            vmem_limit_bytes=32 * 1024 * 1024),
        cost_estimate=pl.CostEstimate(flops=int(flops),
                                      transcendentals=int(transcendentals),
                                      bytes_accessed=int(bytes_accessed)),
    )(a_hat.astype(compute_dtype), x.astype(compute_dtype),
      *[w.astype(compute_dtype) for w in w_list],
      *scale_list, *shift_list)


def _largest_divisor_leq(b, target):
    g = min(b, target)
    while b % g != 0:
        g -= 1
    return g


class GCNChessPallas:
    """JAX/Pallas port of GCN_chess (inference / eval mode)."""

    def __init__(self, input_dim, hidden_dim, output_dim, num_layers, dropout,
                 return_embeds=False, key=jax.random.PRNGKey(0)):
        self.dropout = dropout
        self.return_embeds = return_embeds
        self.num_layers = num_layers
        dims = [input_dim] + [hidden_dim] * (num_layers - 1) + [output_dim]
        self.dims = dims

        # GCNConv params: glorot-uniform weight, zero bias.
        self.weights, self.biases = [], []
        for i in range(num_layers):
            key, wkey = jax.random.split(key)
            fan_in, fan_out = dims[i], dims[i + 1]
            limit = jnp.sqrt(6.0 / (fan_in + fan_out))
            w = jax.random.uniform(wkey, (fan_in, fan_out), jnp.float32, -limit, limit)
            self.weights.append(w)
            self.biases.append(jnp.zeros((fan_out,), jnp.float32))

        # BatchNorm1d (eval mode, default running stats) folded to scale/shift.
        eps = 1e-5
        self.bn_scale, self.bn_shift = [], []
        for _ in range(num_layers - 1):
            gamma = jnp.ones((hidden_dim,), jnp.float32)
            beta = jnp.zeros((hidden_dim,), jnp.float32)
            run_mean = jnp.zeros((hidden_dim,), jnp.float32)
            run_var = jnp.ones((hidden_dim,), jnp.float32)
            s = gamma / jnp.sqrt(run_var + eps)
            self.bn_scale.append(s)
            self.bn_shift.append(beta - run_mean * s)

        # ---- Pack per-layer params once for the fused kernel ----
        # Contraction (K) dims: only minimal sublane padding for layer 0;
        # lane / output dims: padded to 128 for lane-dense stores.
        pad_dims = [_round_up(input_dim, SUBLANE)] + [_round_up(d, LANE) for d in dims[1:]]
        self.pad_dims = pad_dims
        self.w_pad, self.scale_pad, self.shift_pad = [], [], []
        for i in range(num_layers):
            k_pad, f_pad = pad_dims[i], pad_dims[i + 1]
            fi, fo = dims[i], dims[i + 1]
            w = jnp.zeros((k_pad, f_pad), jnp.float32).at[:fi, :fo].set(self.weights[i])
            self.w_pad.append(w)
            shift = jnp.zeros((1, f_pad), jnp.float32)
            if i < num_layers - 1:
                s, sh = self.bn_scale[i], self.bn_shift[i]
                scale = jnp.zeros((1, f_pad), jnp.float32).at[0, :fo].set(s)
                # Fold bias into BN shift: (h + b)*s + sh == h*s + (b*s + sh)
                shift = shift.at[0, :fo].set(self.biases[i] * s + sh)
                self.scale_pad.append(scale)
            else:
                shift = shift.at[0, :fo].set(self.biases[i])
            self.shift_pad.append(shift)

    def __call__(self, x, a_hat, compute_dtype=jnp.bfloat16, boards_per_step=4):
        # Accept a single graph (N, F)/(N, N) or a batch (B, N, F)/(B, N, N).
        single = (x.ndim == 2)
        if single:
            x, a_hat = x[None], a_hat[None]
        b, n, f_in = x.shape
        if f_in != self.pad_dims[0]:
            # Only needed when input_dim is not sublane-aligned (not the case here).
            x = jnp.pad(x, ((0, 0), (0, 0), (0, self.pad_dims[0] - f_in)))
        g = _largest_divisor_leq(b, boards_per_step)
        out_pad = gcn_forward_fused(
            a_hat, x, self.w_pad, self.scale_pad, self.shift_pad,
            output_dim=self.dims[-1],
            apply_log_softmax=not self.return_embeds,
            compute_dtype=compute_dtype,
            boards_per_step=g)
        out = out_pad[..., :self.dims[-1]]
        return out[0] if single else out


def _build_normalized_adjacency(key, n):
    # Random symmetric binary adjacency with self-loops, GCN-normalized.
    a = (jax.random.uniform(key, (n, n)) < 0.1).astype(jnp.float32)
    a = jnp.maximum(a, a.T)
    a = a * (1.0 - jnp.eye(n)) + jnp.eye(n)
    deg = jnp.sum(a, axis=1)
    d_inv_sqrt = 1.0 / jnp.sqrt(deg)
    return a * d_inv_sqrt[:, None] * d_inv_sqrt[None, :]


def _ref_forward(model, x, a_hat, compute_dtype):
    """Pure-JAX batched reference mirroring the kernel's numeric path (eval mode)."""
    a = a_hat.astype(compute_dtype)
    h = x
    num_layers = model.num_layers
    for i in range(num_layers):
        xw = jnp.einsum('bnk,kf->bnf', h.astype(compute_dtype),
                        model.weights[i].astype(compute_dtype),
                        preferred_element_type=jnp.float32)
        h = jnp.einsum('bij,bjf->bif', a, xw.astype(compute_dtype),
                       preferred_element_type=jnp.float32)
        h = h + model.biases[i][None, None, :]
        if i < num_layers - 1:
            h = h * model.bn_scale[i][None, None, :] + model.bn_shift[i][None, None, :]
            h = jnp.maximum(h, 0.0)
        elif not model.return_embeds:
            h = jax.nn.log_softmax(h, axis=-1)
    return h


if __name__ == "__main__":
    key = jax.random.PRNGKey(0)
    k_adj, k_feat, k_param = jax.random.split(key, 3)

    B = 8             # boards per call (batched; grid of B/4 groups)
    N = 64            # nodes per board (chess squares)
    INPUT_DIM = 16
    HIDDEN_DIM = 32
    OUTPUT_DIM = 8
    NUM_LAYERS = 3
    DROPOUT = 0.5

    x = jax.random.normal(k_feat, (B, N, INPUT_DIM), jnp.float32)
    a_hat = jnp.stack([_build_normalized_adjacency(k, N)
                       for k in jax.random.split(k_adj, B)])

    model = GCNChessPallas(INPUT_DIM, HIDDEN_DIM, OUTPUT_DIM, NUM_LAYERS,
                           DROPOUT, return_embeds=False, key=k_param)

    # f32 path: tight correctness check against the pure-JAX reference.
    out_f32 = jax.block_until_ready(model(x, a_hat, compute_dtype=jnp.float32))
    ref_f32 = jax.block_until_ready(_ref_forward(model, x, a_hat, jnp.float32))
    assert out_f32.shape == (B, N, OUTPUT_DIM)
    assert jnp.allclose(out_f32, ref_f32, atol=1e-4, rtol=1e-4)

    # bf16 MXU-feed path (perf path): check against a matching reference.
    out_bf16 = jax.block_until_ready(model(x, a_hat, compute_dtype=jnp.bfloat16))
    ref_bf16 = jax.block_until_ready(_ref_forward(model, x, a_hat, jnp.bfloat16))
    assert out_bf16.shape == (B, N, OUTPUT_DIM)
    assert jnp.allclose(out_bf16, ref_bf16, atol=2e-2, rtol=2e-2)

    # Single-graph path (matches the original module's (x, adj_t) signature).
    out_single = jax.block_until_ready(model(x[0], a_hat[0], compute_dtype=jnp.float32))
    assert out_single.shape == (N, OUTPUT_DIM)
    assert jnp.allclose(out_single, ref_f32[0], atol=1e-4, rtol=1e-4)

    print("KERNEL_OK")
</pallas_src>

<mosaic_0001>
module attributes {stable_mosaic.version = 11 : i64} {
  func.func @_fused_gcn_kernel(%arg0: i32, %arg1: memref<4x64x64xf32, #tpu.memory_space<vmem>>, %arg2: memref<4x64x16xf32, #tpu.memory_space<vmem>>, %arg3: memref<16x128xf32, #tpu.memory_space<vmem>>, %arg4: memref<128x128xf32, #tpu.memory_space<vmem>>, %arg5: memref<128x128xf32, #tpu.memory_space<vmem>>, %arg6: memref<1x128xf32, #tpu.memory_space<vmem>>, %arg7: memref<1x128xf32, #tpu.memory_space<vmem>>, %arg8: memref<1x128xf32, #tpu.memory_space<vmem>>, %arg9: memref<1x128xf32, #tpu.memory_space<vmem>>, %arg10: memref<1x128xf32, #tpu.memory_space<vmem>>, %arg11: memref<4x64x128xf32, #tpu.memory_space<vmem>>) attributes {dimension_semantics = [#tpu.dimension_semantics<parallel>], iteration_bounds = array<i64: 2>, scalar_prefetch = 0 : i64, scratch_operands = 0 : i64, tpu.core_type = #tpu.core_type<tc>, window_params = [{transform_indices = @transform_0, window_bounds = array<i64: 4, 64, 64>}, {transform_indices = @transform_1, window_bounds = array<i64: 4, 64, 16>}, {pipeline_mode = #tpu.pipeline_mode<synchronous>, transform_indices = @transform_2, window_bounds = array<i64: 16, 128>}, {pipeline_mode = #tpu.pipeline_mode<synchronous>, transform_indices = @transform_3, window_bounds = array<i64: 128, 128>}, {pipeline_mode = #tpu.pipeline_mode<synchronous>, transform_indices = @transform_4, window_bounds = array<i64: 128, 128>}, {pipeline_mode = #tpu.pipeline_mode<synchronous>, transform_indices = @transform_5, window_bounds = array<i64: 1, 128>}, {pipeline_mode = #tpu.pipeline_mode<synchronous>, transform_indices = @transform_6, window_bounds = array<i64: 1, 128>}, {pipeline_mode = #tpu.pipeline_mode<synchronous>, transform_indices = @transform_7, window_bounds = array<i64: 1, 128>}, {pipeline_mode = #tpu.pipeline_mode<synchronous>, transform_indices = @transform_8, window_bounds = array<i64: 1, 128>}, {pipeline_mode = #tpu.pipeline_mode<synchronous>, transform_indices = @transform_9, window_bounds = array<i64: 1, 128>}, {transform_indices = @transform_10, window_bounds = array<i64: 4, 64, 128>}]} {
    %c0 = arith.constant 0 : index
    %c0_0 = arith.constant 0 : index
    %c0_1 = arith.constant 0 : index
    %0 = vector.load %arg1[%c0, %c0_0, %c0_1] : memref<4x64x64xf32, #tpu.memory_space<vmem>>, vector<4x64x64xf32>
    %c0_2 = arith.constant 0 : index
    %c0_3 = arith.constant 0 : index
    %c0_4 = arith.constant 0 : index
    %1 = vector.load %arg2[%c0_2, %c0_3, %c0_4] : memref<4x64x16xf32, #tpu.memory_space<vmem>>, vector<4x64x16xf32>
    %2 = vector.shape_cast %1 : vector<4x64x16xf32> to vector<256x16xf32>
    %c0_5 = arith.constant 0 : index
    %c0_6 = arith.constant 0 : index
    %3 = vector.load %arg3[%c0_5, %c0_6] : memref<16x128xf32, #tpu.memory_space<vmem>>, vector<16x128xf32>
    %cst = arith.constant dense<0.000000e+00> : vector<256x128xf32>
    %4 = tpu.matmul %2, %3, %cst {dimension_numbers = #tpu.dot_dimension_numbers<[1], [0], [0], [1], [0, 0, 1, 1], [], []>} : vector<256x16xf32>, vector<16x128xf32>, vector<256x128xf32> -> vector<256x128xf32>
    %5 = vector.shape_cast %4 : vector<256x128xf32> to vector<4x64x128xf32>
    "tpu.trace_start"() <{level = 10 : i32, message = "gij,gjf->gif"}> : () -> ()
    %cst_7 = arith.constant dense<0.000000e+00> : vector<4x64x128xf32>
    %6 = tpu.matmul %0, %5, %cst_7 {dimension_numbers = #tpu.dot_dimension_numbers<[2], [1], [1], [2], [0, 0, 0, 1, 1, 2], [0], [0]>} : vector<4x64x64xf32>, vector<4x64x128xf32>, vector<4x64x128xf32> -> vector<4x64x128xf32>
    "tpu.trace_stop"() : () -> ()
    %7 = vector.shape_cast %6 : vector<4x64x128xf32> to vector<256x128xf32>
    %c0_8 = arith.constant 0 : index
    %c0_9 = arith.constant 0 : index
    %8 = vector.load %arg6[%c0_8, %c0_9] : memref<1x128xf32, #tpu.memory_space<vmem>>, vector<1x128xf32>
    %9 = vector.broadcast %8 : vector<1x128xf32> to vector<256x128xf32>
    %10 = arith.mulf %7, %9 : vector<256x128xf32>
    %c0_10 = arith.constant 0 : index
    %c0_11 = arith.constant 0 : index
    %11 = vector.load %arg8[%c0_10, %c0_11] : memref<1x128xf32, #tpu.memory_space<vmem>>, vector<1x128xf32>
    %12 = vector.broadcast %11 : vector<1x128xf32> to vector<256x128xf32>
    %13 = arith.addf %10, %12 : vector<256x128xf32>
    %cst_12 = arith.constant 0.000000e+00 : f32
    %14 = vector.broadcast %cst_12 : f32 to vector<256x128xf32>
    %15 = arith.maximumf %13, %14 : vector<256x128xf32>
    %c0_13 = arith.constant 0 : index
    %c0_14 = arith.constant 0 : index
    %16 = vector.load %arg4[%c0_13, %c0_14] : memref<128x128xf32, #tpu.memory_space<vmem>>, vector<128x128xf32>
    %cst_15 = arith.constant dense<0.000000e+00> : vector<256x128xf32>
    %17 = tpu.matmul %15, %16, %cst_15 {dimension_numbers = #tpu.dot_dimension_numbers<[1], [0], [0], [1], [0, 0, 1, 1], [], []>} : vector<256x128xf32>, vector<128x128xf32>, vector<256x128xf32> -> vector<256x128xf32>
    %18 = vector.shape_cast %17 : vector<256x128xf32> to vector<4x64x128xf32>
    "tpu.trace_start"() <{level = 10 : i32, message = "gij,gjf->gif"}> : () -> ()
    %cst_16 = arith.constant dense<0.000000e+00> : vector<4x64x128xf32>
    %19 = tpu.matmul %0, %18, %cst_16 {dimension_numbers = #tpu.dot_dimension_numbers<[2], [1], [1], [2], [0, 0, 0, 1, 1, 2], [0], [0]>} : vector<4x64x64xf32>, vector<4x64x128xf32>, vector<4x64x128xf32> -> vector<4x64x128xf32>
    "tpu.trace_stop"() : () -> ()
    %20 = vector.shape_cast %19 : vector<4x64x128xf32> to vector<256x128xf32>
    %c0_17 = arith.constant 0 : index
    %c0_18 = arith.constant 0 : index
    %21 = vector.load %arg7[%c0_17, %c0_18] : memref<1x128xf32, #tpu.memory_space<vmem>>, vector<1x128xf32>
    %22 = vector.broadcast %21 : vector<1x128xf32> to vector<256x128xf32>
    %23 = arith.mulf %20, %22 : vector<256x128xf32>
    %c0_19 = arith.constant 0 : index
    %c0_20 = arith.constant 0 : index
    %24 = vector.load %arg9[%c0_19, %c0_20] : memref<1x128xf32, #tpu.memory_space<vmem>>, vector<1x128xf32>
    %25 = vector.broadcast %24 : vector<1x128xf32> to vector<256x128xf32>
    %26 = arith.addf %23, %25 : vector<256x128xf32>
    %cst_21 = arith.constant 0.000000e+00 : f32
    %27 = vector.broadcast %cst_21 : f32 to vector<256x128xf32>
    %28 = arith.maximumf %26, %27 : vector<256x128xf32>
    %c0_22 = arith.constant 0 : index
    %c0_23 = arith.constant 0 : index
    %29 = vector.load %arg5[%c0_22, %c0_23] : memref<128x128xf32, #tpu.memory_space<vmem>>, vector<128x128xf32>
    %cst_24 = arith.constant dense<0.000000e+00> : vector<256x128xf32>
    %30 = tpu.matmul %28, %29, %cst_24 {dimension_numbers = #tpu.dot_dimension_numbers<[1], [0], [0], [1], [0, 0, 1, 1], [], []>} : vector<256x128xf32>, vector<128x128xf32>, vector<256x128xf32> -> vector<256x128xf32>
    %31 = vector.shape_cast %30 : vector<256x128xf32> to vector<4x64x128xf32>
    "tpu.trace_start"() <{level = 10 : i32, message = "gij,gjf->gif"}> : () -> ()
    %cst_25 = arith.constant dense<0.000000e+00> : vector<4x64x128xf32>
    %32 = tpu.matmul %0, %31, %cst_25 {dimension_numbers = #tpu.dot_dimension_numbers<[2], [1], [1], [2], [0, 0, 0, 1, 1, 2], [0], [0]>} : vector<4x64x64xf32>, vector<4x64x128xf32>, vector<4x64x128xf32> -> vector<4x64x128xf32>
    "tpu.trace_stop"() : () -> ()
    %33 = vector.shape_cast %32 : vector<4x64x128xf32> to vector<256x128xf32>
    %c0_26 = arith.constant 0 : index
    %c0_27 = arith.constant 0 : index
    %34 = vector.load %arg10[%c0_26, %c0_27] : memref<1x128xf32, #tpu.memory_space<vmem>>, vector<1x128xf32>
    %35 = vector.broadcast %34 : vector<1x128xf32> to vector<256x128xf32>
    %36 = arith.addf %33, %35 : vector<256x128xf32>
    %37 = tpu.iota {dimensions = array<i32: 1>} : vector<256x128xi32>
    %c8_i32 = arith.constant 8 : i32
    %38 = vector.broadcast %c8_i32 : i32 to vector<256x128xi32>
    %39 = arith.cmpi slt, %37, %38 : vector<256x128xi32>
    %cst_28 = arith.constant -1.000000e+30 : f32
    %40 = vector.broadcast %cst_28 : f32 to vector<256x128xf32>
    %41 = arith.select %39, %36, %40 : vector<256x128xi1>, vector<256x128xf32>
    %cst_29 = arith.constant dense<0xFF800000> : vector<256xf32>
    %42 = vector.multi_reduction <maximumf>, %41, %cst_29 [1] : vector<256x128xf32> to vector<256xf32>
    %43 = vector.shape_cast %42 : vector<256xf32> to vector<256x1xf32>
    %44 = vector.broadcast %43 : vector<256x1xf32> to vector<256x128xf32>
    %45 = arith.subf %41, %44 : vector<256x128xf32>
    %46 = math.exp %45 : vector<256x128xf32>
    %cst_30 = arith.constant dense<0.000000e+00> : vector<256xf32>
    %47 = vector.multi_reduction <add>, %46, %cst_30 [1] : vector<256x128xf32> to vector<256xf32>
    %48 = vector.shape_cast %47 : vector<256xf32> to vector<256x1xf32>
    %49 = math.log %48 : vector<256x1xf32>
    %50 = vector.broadcast %49 : vector<256x1xf32> to vector<256x128xf32>
    %51 = arith.subf %45, %50 : vector<256x128xf32>
    %cst_31 = arith.constant 0.000000e+00 : f32
    %52 = vector.broadcast %cst_31 : f32 to vector<256x128xf32>
    %53 = arith.select %39, %51, %52 : vector<256x128xi1>, vector<256x128xf32>
    %54 = vector.shape_cast %53 : vector<256x128xf32> to vector<4x64x128xf32>
    %c0_32 = arith.constant 0 : index
    %c0_33 = arith.constant 0 : index
    %c0_34 = arith.constant 0 : index
    %55 = vector.load %arg11[%c0_32, %c0_33, %c0_34] : memref<4x64x128xf32, #tpu.memory_space<vmem>>, vector<4x64x128xf32>
    tpu.vector_store %arg11[%c0_32, %c0_33, %c0_34], %54 {strides = array<i32>} : memref<4x64x128xf32, #tpu.memory_space<vmem>>, vector<4x64x128xf32>,
    return
  }
  func.func @transform_0(%arg0: i32) -> (i32, i32, i32) {
    %c0_i32 = arith.constant 0 : i32
    %c0_i32_0 = arith.constant 0 : i32
    %c0_i32_1 = arith.constant 0 : i32
    return %arg0, %c0_i32, %c0_i32_0 : i32, i32, i32
  }
  func.func @transform_1(%arg0: i32) -> (i32, i32, i32) {
    %c0_i32 = arith.constant 0 : i32
    %c0_i32_0 = arith.constant 0 : i32
    %c0_i32_1 = arith.constant 0 : i32
    return %arg0, %c0_i32, %c0_i32_0 : i32, i32, i32
  }
  func.func @transform_2(%arg0: i32) -> (i32, i32) {
    %c0_i32 = arith.constant 0 : i32
    %c0_i32_0 = arith.constant 0 : i32
    %c0_i32_1 = arith.constant 0 : i32
    return %c0_i32, %c0_i32_0 : i32, i32
  }
  func.func @transform_3(%arg0: i32) -> (i32, i32) {
    %c0_i32 = arith.constant 0 : i32
    %c0_i32_0 = arith.constant 0 : i32
    %c0_i32_1 = arith.constant 0 : i32
    return %c0_i32, %c0_i32_0 : i32, i32
  }
  func.func @transform_4(%arg0: i32) -> (i32, i32) {
    %c0_i32 = arith.constant 0 : i32
    %c0_i32_0 = arith.constant 0 : i32
    %c0_i32_1 = arith.constant 0 : i32
    return %c0_i32, %c0_i32_0 : i32, i32
  }
  func.func @transform_5(%arg0: i32) -> (i32, i32) {
    %c0_i32 = arith.constant 0 : i32
    %c0_i32_0 = arith.constant 0 : i32
    %c0_i32_1 = arith.constant 0 : i32
    return %c0_i32, %c0_i32_0 : i32, i32
  }
  func.func @transform_6(%arg0: i32) -> (i32, i32) {
    %c0_i32 = arith.constant 0 : i32
    %c0_i32_0 = arith.constant 0 : i32
    %c0_i32_1 = arith.constant 0 : i32
    return %c0_i32, %c0_i32_0 : i32, i32
  }
  func.func @transform_7(%arg0: i32) -> (i32, i32) {
    %c0_i32 = arith.constant 0 : i32
    %c0_i32_0 = arith.constant 0 : i32
    %c0_i32_1 = arith.constant 0 : i32
    return %c0_i32, %c0_i32_0 : i32, i32
  }
  func.func @transform_8(%arg0: i32) -> (i32, i32) {
    %c0_i32 = arith.constant 0 : i32
    %c0_i32_0 = arith.constant 0 : i32
    %c0_i32_1 = arith.constant 0 : i32
    return %c0_i32, %c0_i32_0 : i32, i32
  }
  func.func @transform_9(%arg0: i32) -> (i32, i32) {
    %c0_i32 = arith.constant 0 : i32
    %c0_i32_0 = arith.constant 0 : i32
    %c0_i32_1 = arith.constant 0 : i32
    return %c0_i32, %c0_i32_0 : i32, i32
  }
  func.func @transform_10(%arg0: i32) -> (i32, i32, i32) {
    %c0_i32 = arith.constant 0 : i32
    %c0_i32_0 = arith.constant 0 : i32
    %c0_i32_1 = arith.constant 0 : i32
    return %arg0, %c0_i32, %c0_i32_0 : i32, i32, i32
  }
}

</mosaic_0001>

<bundles_post_ra>
// kernel: tpu_custom_call.1
= control target key start
LH: loop header
LB: loop body
LE: loop exit
PB: predicated region body
PF: predicated region fallthrough
CT: control target
= control target key end

     0   :  { %15 = vsyncpa [#allocation3], 0  ;;  %s6342_s0 = inlined_call_operand.vmem [shape: f32[8,64,64], index: 0, kind: input, shape index: {}]   ;;  %s6343_s1 = inlined_call_operand.vmem [shape: f32[8,64,16], index: 1, kind: input, shape index: {}]   ;;  %s6344_s2 = inlined_call_operand.hbm [shape: f32[16,128], index: 2, kind: input, shape index: {}]   ;;  %s6345_s3 = inlined_call_operand.vmem [shape: f32[128,128], index: 3, kind: input, shape index: {}]   ;;  %s6346_s4 = inlined_call_operand.hbm [shape: f32[128,128], index: 4, kind: input, shape index: {}]   ;;  %s6347_s5 = inlined_call_operand.vmem [shape: f32[1,128], index: 5, kind: input, shape index: {}]   ;;  %s6348_s6 = inlined_call_operand.vmem [shape: f32[1,128], index: 6, kind: input, shape index: {}]   ;;  %s6349_s7 = inlined_call_operand.vmem [shape: f32[1,128], index: 7, kind: input, shape index: {}]   ;;  %s6350_s8 = inlined_call_operand.vmem [shape: f32[1,128], index: 8, kind: input, shape index: {}]   ;;  %s6351_s9 = inlined_call_operand.vmem [shape: f32[1,128], index: 9, kind: input, shape index: {}]   ;;  %s6352_s10 = inlined_call_operand.hbm [shape: f32[8,64,128], index: 10, kind: output, shape index: {}]  }
   0x1   :  { %16 = vsyncpa [#allocation6], 0 }
   0x2   :  { %17 = vsyncpa [#allocation4], 0 }
   0x3   :  { %19 = vsyncpa [#allocation4 + $0x1], 0  ;;  %s5143_s13 = smov 0   ;;  %s5145_s14 = smov 0  }
   0x4   :  { %s5147_s15 = smov 0   ;;  %s5149_s16 = smov 0  }
   0x5 LB: > { %6360 = sst [smem:[#allocation11_spill]] %s5075_s15  ;;  %s5164_s17 = sadd.s32 4294967295, %s5079_s16   ;;  %s5079_s16 = sphi %s5149_s16, %s6376_s16   ;;  %s5075_s15 = sphi %s5147_s15, %s6378_s15   ;;  %s5071_s14 = sphi %s5145_s14, %s6380_s14   ;;  %s5067_s13 = sphi %s5143_s13, %s6379_s13  }
   0x6   : > { %s3435_s18 = sadd.s32 4294967294, %s5079_s16   ;;  %s5168_s19 = sadd.s32 1, %s5079_s16  }
   0x7   : > { %6361 = sst [smem:[#allocation12_spill]] %s5168_s19  ;;  %s252_s20 = sadd.s32 1, %s5075_s15 }
   0x8   : > { %s249_s21 = ssub.s32 %s5079_s16, %s5168_s19  ;;  %p262_p0 = scmp.ne.s32.totalorder %s5075_s15, %s5071_s14 }
   0x9   : > { %p250_p1 = scmp.eq.s32.totalorder %s249_s21, 0  ;;  %p263_p2 = scmp.eq.s32.totalorder %s5164_s17, 1 }
   0xa   : > { %p268_p3 = scmp.ne.s32.totalorder %s5071_s14, %s5067_s13  ;;  %p269_p4 = scmp.eq.s32.totalorder %s3435_s18, 1 }
   0xb   : > { %s5179_s22 = scalar_select %p250_p1, %s5075_s15, %s252_s20  }
   0xc   : > { %p5181_p5 = por %p263_p2, %p262_p0  ;;  %p5185_p6 = por %p269_p4, %p268_p3 }
   0xd   : > { %6362 = sst [smem:[#allocation13_spill]] %s5179_s22  ;;  %p3436_p7 = scmp.ge.s32.totalorder %s5079_s16, 1 }
   0xe   : > { %s6363_s23 = scalar_select %p5181_p5, 1, 0 }
   0xf   : > { %s6364_s24 = scalar_select %p5185_p6, 1, 0 }
  0x10   : > { %p276_p8 = scmp.lt.s32.totalorder %s5079_s16, 3  ;;  %p6353_p9 = scmp.eq.s32.totalorder %s5164_s17, 0 }
  0x11   : > { %6365 = sst [smem:[#allocation14_spill]] %s6364_s24  ;;  %s5081_s26 = smov [#allocation2]  }
  0x12   : > { %p5192_p10 = pnand %p3436_p7, %p276_p8  ;;  %s288_s27 = sshll.u32 %s5081_s26, 4  ;;  %s289_s27 = int_to_ptr.vmem [resolvable:$true] %s288_s27 }
  0x13   : > { %s5082_s29 = smov [#allocation5]   ;;  %s4953_s18 = scalar_lea.hbm %s6344_s2, 256 }
  0x14   : > { %s6366_s25 = scalar_select %p5192_p10, 1, 0 }
  0x15   : > { %p4741_p11 = pneg %p5192_p10  ;;  %s304_s30 = sshll.u32 %s5082_s29, 4  ;;  %s5204_s30 = int_to_ptr.vmem [resolvable:$true] %s304_s30 }
  0x16   : > { %p4954_p13 = scmp.ne.s32.totalorder %s6344_s2, %s4953_s18  ;;  %p4960_p3 = scmp.lt.u32.totalorder %s4953_s18, %s6344_s2 }
  0x17   : > { %p5200_p12 = pnand %p6353_p9, %p4741_p11 }
  0x19   : > { %p4955_p0 = pneg %p5200_p12 }
  0x1b   : > { %p4956_p1 = pnand %p4955_p0, %p4954_p13 }
  0x1d   : > { %p4957_p2 = pneg %p4956_p1 }
  0x1f   : > { %p4962_p4 = pnand %p4960_p3, %p4957_p2 }
  0x21   : > { %4965 = shalt.err (!%p4962_p4)
}
  0x22   : > { %s4966_s29 = scalar_lea.vmem %s289_s27, 256  ;;  %p4974_p9 = scmp.lt.s32.totalorder %s289_s27, %s289_s27 }
  0x23   : > { %p4967_p7 = scmp.ne.s32.totalorder %s289_s27, %s4966_s29  ;;  %p4975_p6 = scmp.lt.s32.totalorder %s4966_s29, %s4966_s29 }
  0x25   : > { %p4969_p8 = pnand %p4967_p7, %p4955_p0  ;;  %p4976_p5 = por %p4975_p6, %p4974_p9 }
  0x27   : > { %p4970_p11 = pneg %p4969_p8 }
  0x29   : > { %p4977_p10 = pnand %p4976_p5, %p4970_p11 }
  0x2b   : > { %4980 = shalt.err (!%p4977_p10)
}
  0x2c   : > { %s5083_s11 = smov 128   ;;  %s5084_s12 = smov 8  }
  0x2d   : > { %4744 = dma.hbm_to_vmem [thread:$0]  (!%p5200_p12), %s6344_s2, 256, %s289_s27, [#allocation3], %s5083_s11, %s5083_s11, %s5084_s12  }
  0x2e   : > { %s4981_s26 = scalar_lea.hbm %s6346_s4, 2048 }
  0x2f   : > { %p4982_p13 = scmp.ne.s32.totalorder %s6346_s4, %s4981_s26  ;;  %p4988_p9 = scmp.lt.u32.totalorder %s4981_s26, %s6346_s4 }
  0x31   : > { %p4984_p5 = pnand %p4982_p13, %p4955_p0 }
  0x33   : > { %p4985_p6 = pneg %p4984_p5 }
  0x35   : > { %p4990_p10 = pnand %p4988_p9, %p4985_p6 }
  0x37   : > { %4993 = shalt.err (!%p4990_p10)
}
  0x38   : > { %s4994_s27 = scalar_lea.vmem %s5204_s30, 2048  ;;  %p5002_p4 = scmp.lt.s32.totalorder %s5204_s30, %s5204_s30 }
  0x39   : > { %p4995_p1 = scmp.ne.s32.totalorder %s5204_s30, %s4994_s27  ;;  %p5003_p7 = scmp.lt.s32.totalorder %s4994_s27, %s4994_s27 }
  0x3b   : > { %p4997_p2 = pnand %p4995_p1, %p4955_p0  ;;  %p5004_p8 = por %p5003_p7, %p5002_p4 }
  0x3d   : > { %p4998_p3 = pneg %p4997_p2 }
  0x3f   : > { %p5005_p11 = pnand %p5004_p8, %p4998_p3 }
  0x41   : > { %5008 = shalt.err (!%p5005_p11)
}
  0x42   : > { %4747 = dma.hbm_to_vmem [thread:$0]  (!%p5200_p12), %s6346_s4, 2048, %s5204_s30, [#allocation6], %s5083_s11, %s5083_s11, %s5084_s12  }
  0x43   : > { %p6368_p13 = scmp.ne.s32.totalorder %s6366_s25, 0 }
  0x44   : > { %p6369_p5 = scmp.eq.s32.totalorder (!%p6368_p13), %s5164_s17, 0 }
  0x45   : > { %355 = sbr.rel (%p6368_p13) target bundleno = 1832 (0x728), region = 60 }
  0x4c   : > { %5054 = dma.done.wait (%p6369_p5), [#allocation3], 256   ;;  %p6370_p0 = pmov %p6369_p5 }
  0x4e   : > { %5056 = vsyncadd (%p6370_p0), [#allocation3], 4294967040  ;;  %p6371_p6 = pmov %p6370_p0 }
  0x4f   : > { %p6372_p9 = pmov %p6370_p0 }
  0x50   : > { %5058 = dma.done.wait (%p6371_p6), [#allocation6], 2048  }
  0x51   : > { %5060 = vsyncadd (%p6372_p9), [#allocation6], 4294965248  ;;  %s3444_s24 = sshll.u32 %s5164_s17, 2  ;;  %vm485_vm0 = vcmask 130048   ;;  %v483_v0 = vld [vmem:[#allocation2] sm:$0xff]  ;;  %v484_v1 = vld [vmem:[#allocation2 + $0x8] sm:$0xff] }
  0x52   : > { %p405_p10 = scmp.lt.s32.totalorder %s3444_s24, 7  ;;  %v4463_v3 = vpack.c.bf16 %v484_v1, %v483_v0  ;;  %vm807_vm1 = vcmask 523264   ;;  %v1434_v36 = vld [vmem:[%s6345_s3] sm:$0xff]  ;;  %v1435_v37 = vld [vmem:[%s6345_s3 + $0x8] sm:$0xff]  ;;  %v1436_v38 = vld [vmem:[%s6345_s3 + $0x10] sm:$0xff]  ;;  %s3592_s26 = sshll.u32 %s5164_s17, 12 }
  0x53   : > { %v4531_v39 = vpack.c.bf16 %v1435_v37, %v1434_v36  ;;  %v1437_v40 = vld [vmem:[%s6345_s3 + $0x18] sm:$0xff]  ;;  %v1438_v42 = vld [vmem:[%s6345_s3 + $0x20] sm:$0xff]  ;;  %v1439_v43 = vld [vmem:[%s6345_s3 + $0x28] sm:$0xff]  ;;  %s6289_s19 = scalar_lea.hbm %s6352_s10, %s3592_s26  ;;  %p6373_p1 = scmp.ne.s32.totalorder %s6363_s23, 0 }
  0x54   : > { %s6382_s24 = smov (!%p405_p10, %s3444_s24), 7  ;;  %4464 = vmatprep.subr.bf16.mxu0 %v4463_v3  ;;  %v4535_v41 = vpack.c.bf16 %v1437_v40, %v1436_v38  ;;  %v4539_v44 = vpack.c.bf16 %v1439_v43, %v1438_v42  ;;  %v1440_v45 = vld [vmem:[%s6345_s3 + $0x30] sm:$0xff]  ;;  %v1441_v46 = vld [vmem:[%s6345_s3 + $0x38] sm:$0xff]  ;;  %v1442_v48 = vld [vmem:[%s6345_s3 + $0x40] sm:$0xff] }
  0x55   : > { %s3589_s25 = sshll.u32 %s6382_s24, 6  ;;  %4466 = vmatpush3.bf16.msra.mxu0 %v4463_v3  ;;  %v4543_v47 = vpack.c.bf16 %v1441_v46, %v1440_v45  ;;  %v1443_v49 = vld [vmem:[%s6345_s3 + $0x48] sm:$0xff]  ;;  %v1444_v51 = vld [vmem:[%s6345_s3 + $0x50] sm:$0xff]  ;;  %v1445_v52 = vld [vmem:[%s6345_s3 + $0x58] sm:$0xff] }
  0x56   : > { %s5272_s11 = scalar_lea.vmem %s6343_s1, %s3589_s25  ;;  %s5343_s18 = scalar_lea.vmem %s6342_s0, %s3589_s25  ;;  %4532 = vmatprep.subr.bf16.mxu0 %v4531_v39  ;;  %v4547_v50 = vpack.c.bf16 %v1443_v49, %v1442_v48  ;;  %v4551_v53 = vpack.c.bf16 %v1445_v52, %v1444_v51 }
  0x57   : > { %v451_v2 = vld [vmem:[%s5272_s11] sm:$0xff]  ;;  %v452_v4 = vld [vmem:[%s5272_s11 + $0x8] sm:$0xff]  ;;  %v453_v5 = vld [vmem:[%s5272_s11 + $0x10] sm:$0xff]  ;;  %s5085_s25 = smov [#allocation7]  }
  0x58   : > { %3919 = vmatprep.mubr.msk.f32.mxu0 %vm485_vm0, %v451_v2  ;;  %v454_v6 = vld [vmem:[%s5272_s11 + $0x18] sm:$0xff]  ;;  %v455_v7 = vld [vmem:[%s5272_s11 + $0x20] sm:$0xff]  ;;  %v456_v8 = vld [vmem:[%s5272_s11 + $0x28] sm:$0xff]  ;;  %s5013_s28 = sshll.u32 %s5085_s25, 4  ;;  %s5014_s28 = int_to_ptr.vmem [resolvable:$false] %s5013_s28 }
  0x59   : > { %3920 = vmatmul.mubr.msk.f32.vlgmr.msra.gmra.mrb[0].mxu0 %vm485_vm0, %v452_v4  ;;  %v457_v9 = vld [vmem:[%s5272_s11 + $0x30] sm:$0xff]  ;;  %v458_v10 = vld [vmem:[%s5272_s11 + $0x38] sm:$0xff]  ;;  %v459_v11 = vld [vmem:[%s5272_s11 + $0x40] sm:$0xff]  ;;  %s5015_s30 = scalar_lea.vmem %s5014_s28, 8192 }
  0x5a   : > { %3922 = vmatprep.mubr.msk.f32.mxu0 %vm485_vm0, %v453_v5  ;;  %v460_v12 = vld [vmem:[%s5272_s11 + $0x48] sm:$0xff]  ;;  %v461_v13 = vld [vmem:[%s5272_s11 + $0x50] sm:$0xff]  ;;  %v462_v14 = vld [vmem:[%s5272_s11 + $0x58] sm:$0xff]  ;;  %4534 = vmatpush3.bf16.msra.mxu0 %v4531_v39 }
  0x5b   : > { %v463_v15 = vld [vmem:[%s5272_s11 + $0x60] sm:$0xff]  ;;  %v464_v16 = vld [vmem:[%s5272_s11 + $0x68] sm:$0xff]  ;;  %v465_v17 = vld [vmem:[%s5272_s11 + $0x70] sm:$0xff]  ;;  %4536 = vmatprep.subr.bf16.mxu0 %v4535_v41 }
  0x5c   : > { %v466_v18 = vld [vmem:[%s5272_s11 + $0x78] sm:$0xff]  ;;  %v467_v19 = vld [vmem:[%s5272_s11 + $0x80] sm:$0xff]  ;;  %v468_v20 = vld [vmem:[%s5272_s11 + $0x88] sm:$0xff] }
  0x5d   : > { %3923 = vmatmul.mubr.msk.f32.gmra.mrb[2].mxu0 %vm485_vm0, %v454_v6  ;;  %v469_v21 = vld [vmem:[%s5272_s11 + $0x90] sm:$0xff]  ;;  %v470_v22 = vld [vmem:[%s5272_s11 + $0x98] sm:$0xff]  ;;  %v471_v23 = vld [vmem:[%s5272_s11 + $0xa0] sm:$0xff] }
  0x5e   : > { %3925 = vmatprep.mubr.msk.f32.mxu0 %vm485_vm0, %v455_v7  ;;  %v472_v24 = vld [vmem:[%s5272_s11 + $0xa8] sm:$0xff]  ;;  %v473_v25 = vld [vmem:[%s5272_s11 + $0xb0] sm:$0xff]  ;;  %v474_v26 = vld [vmem:[%s5272_s11 + $0xb8] sm:$0xff]  ;;  %4538 = vmatpush3.bf16.msra.mxu0 %v4535_v41 }
  0x5f   : > { %v475_v27 = vld [vmem:[%s5272_s11 + $0xc0] sm:$0xff]  ;;  %v476_v28 = vld [vmem:[%s5272_s11 + $0xc8] sm:$0xff]  ;;  %v477_v29 = vld [vmem:[%s5272_s11 + $0xd0] sm:$0xff]  ;;  %4540 = vmatprep.subr.bf16.mxu0 %v4539_v44 }
  0x60   : > { %v478_v30 = vld [vmem:[%s5272_s11 + $0xd8] sm:$0xff]  ;;  %v479_v31 = vld [vmem:[%s5272_s11 + $0xe0] sm:$0xff]  ;;  %v480_v32 = vld [vmem:[%s5272_s11 + $0xe8] sm:$0xff] }
  0x61   : > { %3926 = vmatmul.mubr.msk.f32.gmra.mrb[4].mxu0 %vm485_vm0, %v456_v8  ;;  %v481_v33 = vld [vmem:[%s5272_s11 + $0xf0] sm:$0xff]  ;;  %v482_v34 = vld [vmem:[%s5272_s11 + $0xf8] sm:$0xff]  ;;  %v5346_v35 = vld [vmem:[%s5343_s18] sm:$0xff] }
  0x62   : > { %3928 = vmatprep.mubr.msk.f32.mxu0 %vm485_vm0, %v457_v9  ;;  %3983 = vmatprep.mubr.msk.f32.mxu1 %vm807_vm1, %v5346_v35  ;;  %v5387_v4 = vld [vmem:[%s5343_s18 + $0x8] sm:$0xff]  ;;  %v5390_v6 = vld [vmem:[%s5343_s18 + $0x10] sm:$0xff]  ;;  %v5397_v9 = vld [vmem:[%s5343_s18 + $0x18] sm:$0xff] }
  0x63   : > { %4542 = vmatpush3.bf16.msra.mxu0 %v4539_v44  ;;  %v5450_v37 = vld [vmem:[%s5343_s18 + $0x70] sm:$0xff]  ;;  %v5457_v40 = vld [vmem:[%s5343_s18 + $0x78] sm:$0xff]  ;;  %v5460_v42 = vld [vmem:[%s5343_s18 + $0x80] sm:$0xff] }
  0x64   : > { %4544 = vmatprep.subr.bf16.mxu0 %v4543_v47  ;;  %v5467_v45 = vld [vmem:[%s5343_s18 + $0x88] sm:$0xff]  ;;  %v5480_v52 = vld [vmem:[%s5343_s18 + $0xa0] sm:$0xff] }
  0x65   : > { %3929 = vmatmul.mubr.msk.f32.gmra.mrb[6].mxu0 %vm485_vm0, %v458_v10 }
  0x66   : > { %3931 = vmatprep.mubr.msk.f32.mxu0 %vm485_vm0, %v459_v11  ;;  %v5400_v11 = vld [vmem:[%s5343_s18 + $0x20] sm:$0xff] }
  0x67   : > { %4546 = vmatpush3.bf16.msra.mxu0 %v4543_v47  ;;  %v5470_v47 = vld [vmem:[%s5343_s18 + $0x90] sm:$0xff] }
  0x68   : > { %4548 = vmatprep.subr.bf16.mxu0 %v4547_v50 }
  0x69   : > { %3932 = vmatmul.mubr.msk.f32.gmra.mrb[8].mxu0 %vm485_vm0, %v460_v12 }
  0x6a   : > { %3934 = vmatprep.mubr.msk.f32.mxu0 %vm485_vm0, %v461_v13 }
  0x6b   : > { %4550 = vmatpush3.bf16.msra.mxu0 %v4547_v50  ;;  %v5477_v50 = vld [vmem:[%s5343_s18 + $0x98] sm:$0xff] }
  0x6c   : > { %4552 = vmatprep.subr.bf16.mxu0 %v4551_v53 }
  0x6d   : > { %3935 = vmatmul.mubr.msk.f32.gmra.mrb[10].mxu0 %vm485_vm0, %v462_v14  ;;  %v5407_v14 = vld [vmem:[%s5343_s18 + $0x28] sm:$0xff] }
  0x6e   : > { %3937 = vmatprep.mubr.msk.f32.mxu0 %vm485_vm0, %v463_v15 }
  0x6f   : > { %4554 = vmatpush3.bf16.msra.mxu0 %v4551_v53 }
  0x71   : > { %3938 = vmatmul.mubr.msk.f32.gmra.mrb[12].mxu0 %vm485_vm0, %v464_v16  ;;  %v5410_v16 = vld [vmem:[%s5343_s18 + $0x30] sm:$0xff] }
  0x72   : > { %3940 = vmatprep.mubr.msk.f32.mxu0 %vm485_vm0, %v465_v17 }
  0x75   : > { %3941 = vmatmul.mubr.msk.f32.gmra.mrb[14].mxu0 %vm485_vm0, %v466_v18 }
  0x76   : > { %3943 = vmatprep.mubr.msk.f32.mxu0 %vm485_vm0, %v467_v19  ;;  %v5417_v19 = vld [vmem:[%s5343_s18 + $0x38] sm:$0xff] }
  0x79   : > { %3944 = vmatmul.mubr.msk.f32.gmra.mrb[16].mxu0 %vm485_vm0, %v468_v20 }
  0x7a   : > { %3946 = vmatprep.mubr.msk.f32.mxu0 %vm485_vm0, %v469_v21  ;;  %v5420_v21 = vld [vmem:[%s5343_s18 + $0x40] sm:$0xff] }
  0x7d   : > { %3947 = vmatmul.mubr.msk.f32.gmra.mrb[18].mxu0 %vm485_vm0, %v470_v22 }
  0x7e   : > { %3949 = vmatprep.mubr.msk.f32.mxu0 %vm485_vm0, %v471_v23 }
  0x81   : > { %3950 = vmatmul.mubr.msk.f32.gmra.mrb[20].mxu0 %vm485_vm0, %v472_v24  ;;  %v5427_v24 = vld [vmem:[%s5343_s18 + $0x48] sm:$0xff] }
  0x82   : > { %3952 = vmatprep.mubr.msk.f32.mxu0 %vm485_vm0, %v473_v25 }
  0x85   : > { %3953 = vmatmul.mubr.msk.f32.gmra.mrb[22].mxu0 %vm485_vm0, %v474_v26  ;;  %v5430_v26 = vld [vmem:[%s5343_s18 + $0x50] sm:$0xff] }
  0x86   : > { %3955 = vmatprep.mubr.msk.f32.mxu0 %vm485_vm0, %v475_v27 }
  0x89   : > { %3956 = vmatmul.mubr.msk.f32.gmra.mrb[24].mxu0 %vm485_vm0, %v476_v28 }
  0x8a   : > { %3958 = vmatprep.mubr.msk.f32.mxu0 %vm485_vm0, %v477_v29  ;;  %v5437_v29 = vld [vmem:[%s5343_s18 + $0x58] sm:$0xff] }
  0x8d   : > { %3959 = vmatmul.mubr.msk.f32.gmra.mrb[26].mxu0 %vm485_vm0, %v478_v30 }
  0x8e   : > { %3961 = vmatprep.mubr.msk.f32.mxu0 %vm485_vm0, %v479_v31  ;;  %v5440_v31 = vld [vmem:[%s5343_s18 + $0x60] sm:$0xff] }
  0x91   : > { %3962 = vmatmul.mubr.msk.f32.gmra.mrb[28].mxu0 %vm485_vm0, %v480_v32 }
  0x92   : > { %3964 = vmatprep.mubr.msk.f32.mxu0 %vm485_vm0, %v481_v33 }
  0x95   : > { %3965 = vmatmul.mubr.msk.f32.gmra.mrb[30].mxu0 %vm485_vm0, %v482_v34  ;;  %v5447_v34 = vld [vmem:[%s5343_s18 + $0x68] sm:$0xff] }
 0x12c   : > { %v3921_v54 = vpop.f32.mrb[0].mxu0 }
 0x12d   : > { %v648_v55 = vpop.f32.mrb[1].mxu0 }
 0x12e   : > { %v4467_v56 = vpack.c.bf16 %v3921_v54, %v648_v55  ;;  %v5487_v55 = vld [vmem:[%s5343_s18 + $0xa8] sm:$0xff] }
 0x130   : > { %v3924_v57 = vpop.f32.mrb[2].mxu0  ;;  %4468 = vmatprep.subr.bf16.mxu1 %v4467_v56 }
 0x131   : > { %v658_v58 = vpop.f32.mrb[3].mxu0  ;;  %4470 = vmatpush3.bf16.msra.mxu1 %v4467_v56 }
 0x132   : > { %v4471_v59 = vpack.c.bf16 %v3924_v57, %v658_v58  ;;  %v5490_v57 = vld [vmem:[%s5343_s18 + $0xb0] sm:$0xff] }
 0x134   : > { %v3927_v60 = vpop.f32.mrb[4].mxu0  ;;  %4472 = vmatprep.subr.bf16.mxu1 %v4471_v59 }
 0x135   : > { %v668_v61 = vpop.f32.mrb[5].mxu0  ;;  %4474 = vmatpush3.bf16.msra.mxu1 %v4471_v59 }
 0x136   : > { %v4475_v62 = vpack.c.bf16 %v3927_v60, %v668_v61  ;;  %v5497_v60 = vld [vmem:[%s5343_s18 + $0xb8] sm:$0xff] }
 0x138   : > { %v3930_v63 = vpop.f32.mrb[6].mxu0  ;;  %4476 = vmatprep.subr.bf16.mxu1 %v4475_v62 }
 0x139   : > { %v678_v0 = vpop.f32.mrb[7].mxu0  ;;  %4478 = vmatpush3.bf16.msra.mxu1 %v4475_v62  ;;  %v5500_v62 = vld [vmem:[%s5343_s18 + $0xc0] sm:$0xff] }
 0x13a   : > { %v4479_v1 = vpack.c.bf16 %v3930_v63, %v678_v0  ;;  %v5507_v63 = vld [vmem:[%s5343_s18 + $0xc8] sm:$0xff]  ;;  %v5510_v0 = vld [vmem:[%s5343_s18 + $0xd0] sm:$0xff] }
 0x13c   : > { %v3933_v2 = vpop.f32.mrb[8].mxu0  ;;  %4480 = vmatprep.subr.bf16.mxu1 %v4479_v1 }
 0x13d   : > { %v688_v3 = vpop.f32.mrb[9].mxu0  ;;  %4482 = vmatpush3.bf16.msra.mxu1 %v4479_v1  ;;  %v5517_v1 = vld [vmem:[%s5343_s18 + $0xd8] sm:$0xff] }
 0x13e   : > { %v4483_v5 = vpack.c.bf16 %v3933_v2, %v688_v3  ;;  %v5520_v2 = vld [vmem:[%s5343_s18 + $0xe0] sm:$0xff]  ;;  %v5527_v3 = vld [vmem:[%s5343_s18 + $0xe8] sm:$0xff] }
 0x140   : > { %v3936_v7 = vpop.f32.mrb[10].mxu0  ;;  %3984 = vmatmul.mubr.msk.f32.vlgmr.msra.gmra.mrb[0].mxu1 %vm807_vm1, %v5387_v4  ;;  %4484 = vmatprep.subr.bf16.mxu1 %v4483_v5 }
 0x141   : > { %v698_v8 = vpop.f32.mrb[11].mxu0  ;;  %4486 = vmatpush3.bf16.msra.mxu1 %v4483_v5  ;;  %3986 = vmatprep.mubr.msk.f32.mxu1 %vm807_vm1, %v5390_v6  ;;  %v5530_v5 = vld [vmem:[%s5343_s18 + $0xf0] sm:$0xff] }
 0x142   : > { %v4487_v10 = vpack.c.bf16 %v3936_v7, %v698_v8  ;;  %v5537_v7 = vld [vmem:[%s5343_s18 + $0xf8] sm:$0xff]  ;;  %v1446_v8 = vld [vmem:[%s6345_s3 + $0x60] sm:$0xff] }
 0x144   : > { %v3939_v12 = vpop.f32.mrb[12].mxu0  ;;  %3987 = vmatmul.mubr.msk.f32.gmra.mrb[2].mxu1 %vm807_vm1, %v5397_v9  ;;  %4488 = vmatprep.subr.bf16.mxu1 %v4487_v10 }
 0x145   : > { %v708_v13 = vpop.f32.mrb[13].mxu0  ;;  %4490 = vmatpush3.bf16.msra.mxu1 %v4487_v10  ;;  %3989 = vmatprep.mubr.msk.f32.mxu1 %vm807_vm1, %v5400_v11  ;;  %v1447_v10 = vld [vmem:[%s6345_s3 + $0x68] sm:$0xff] }
 0x146   : > { %v4491_v15 = vpack.c.bf16 %v3939_v12, %v708_v13  ;;  %v4555_v12 = vpack.c.bf16 %v1447_v10, %v1446_v8  ;;  %v1448_v13 = vld [vmem:[%s6345_s3 + $0x70] sm:$0xff] }
 0x148   : > { %v3942_v17 = vpop.f32.mrb[14].mxu0  ;;  %3990 = vmatmul.mubr.msk.f32.gmra.mrb[4].mxu1 %vm807_vm1, %v5407_v14  ;;  %4492 = vmatprep.subr.bf16.mxu1 %v4491_v15 }
 0x149   : > { %v718_v18 = vpop.f32.mrb[15].mxu0  ;;  %4494 = vmatpush3.bf16.msra.mxu1 %v4491_v15  ;;  %3992 = vmatprep.mubr.msk.f32.mxu1 %vm807_vm1, %v5410_v16  ;;  %v1449_v15 = vld [vmem:[%s6345_s3 + $0x78] sm:$0xff] }
 0x14a   : > { %v4495_v20 = vpack.c.bf16 %v3942_v17, %v718_v18  ;;  %4556 = vmatprep.subr.bf16.mxu0 %v4555_v12  ;;  %v4559_v17 = vpack.c.bf16 %v1449_v15, %v1448_v13  ;;  %v5558_v18 = vld [vmem:[%s6347_s5] ss:$0 sm:$0xff] }
 0x14b   : > { %4558 = vmatpush3.bf16.msra.mxu0 %v4555_v12 }
 0x14c   : > { %v3945_v22 = vpop.f32.mrb[16].mxu0  ;;  %3993 = vmatmul.mubr.msk.f32.gmra.mrb[6].mxu1 %vm807_vm1, %v5417_v19  ;;  %4496 = vmatprep.subr.bf16.mxu1 %v4495_v20 }
 0x14d   : > { %v728_v23 = vpop.f32.mrb[17].mxu0  ;;  %4498 = vmatpush3.bf16.msra.mxu1 %v4495_v20  ;;  %4011 = vmatprep.mubr.msk.f32.mxu1 %vm807_vm1, %v5420_v21 }
 0x14e   : > { %v4499_v25 = vpack.c.bf16 %v3945_v22, %v728_v23  ;;  %4560 = vmatprep.subr.bf16.mxu0 %v4559_v17  ;;  %v5563_v22 = vld [vmem:[%s6349_s7] ss:$0 sm:$0xff] }
 0x14f   : > { %4562 = vmatpush3.bf16.msra.mxu0 %v4559_v17 }
 0x150   : > { %v3948_v27 = vpop.f32.mrb[18].mxu0  ;;  %4012 = vmatmul.mubr.msk.f32.vlgmr.msra.gmra.mrb[8].mxu1 %vm807_vm1, %v5427_v24  ;;  %4500 = vmatprep.subr.bf16.mxu1 %v4499_v25 }
 0x151   : > { %v738_v28 = vpop.f32.mrb[19].mxu0  ;;  %4502 = vmatpush3.bf16.msra.mxu1 %v4499_v25  ;;  %4014 = vmatprep.mubr.msk.f32.mxu1 %vm807_vm1, %v5430_v26 }
 0x152   : > { %v4503_v30 = vpack.c.bf16 %v3948_v27, %v738_v28 }
 0x154   : > { %v3951_v32 = vpop.f32.mrb[20].mxu0  ;;  %4015 = vmatmul.mubr.msk.f32.gmra.mrb[10].mxu1 %vm807_vm1, %v5437_v29  ;;  %4504 = vmatprep.subr.bf16.mxu1 %v4503_v30 }
 0x155   : > { %v748_v33 = vpop.f32.mrb[21].mxu0  ;;  %4506 = vmatpush3.bf16.msra.mxu1 %v4503_v30  ;;  %4017 = vmatprep.mubr.msk.f32.mxu1 %vm807_vm1, %v5440_v31 }
 0x156   : > { %v4507_v36 = vpack.c.bf16 %v3951_v32, %v748_v33 }
 0x158   : > { %v3954_v38 = vpop.f32.mrb[22].mxu0  ;;  %4018 = vmatmul.mubr.msk.f32.gmra.mrb[12].mxu1 %vm807_vm1, %v5447_v34  ;;  %4508 = vmatprep.subr.bf16.mxu1 %v4507_v36 }
 0x159   : > { %v758_v39 = vpop.f32.mrb[23].mxu0  ;;  %4510 = vmatpush3.bf16.msra.mxu1 %v4507_v36  ;;  %4020 = vmatprep.mubr.msk.f32.mxu1 %vm807_vm1, %v5450_v37 }
 0x15a   : > { %v4511_v41 = vpack.c.bf16 %v3954_v38, %v758_v39 }
 0x15c   : > { %v3957_v43 = vpop.f32.mrb[24].mxu0  ;;  %4021 = vmatmul.mubr.msk.f32.gmra.mrb[14].mxu1 %vm807_vm1, %v5457_v40  ;;  %4512 = vmatprep.subr.bf16.mxu1 %v4511_v41 }
 0x15d   : > { %v768_v44 = vpop.f32.mrb[25].mxu0  ;;  %4514 = vmatpush3.bf16.msra.mxu1 %v4511_v41  ;;  %4039 = vmatprep.mubr.msk.f32.mxu1 %vm807_vm1, %v5460_v42 }
 0x15e   : > { %v4515_v46 = vpack.c.bf16 %v3957_v43, %v768_v44 }
 0x160   : > { %v3960_v48 = vpop.f32.mrb[26].mxu0  ;;  %4040 = vmatmul.mubr.msk.f32.vlgmr.msra.gmra.mrb[16].mxu1 %vm807_vm1, %v5467_v45  ;;  %4516 = vmatprep.subr.bf16.mxu1 %v4515_v46 }
 0x161   : > { %v778_v49 = vpop.f32.mrb[27].mxu0  ;;  %4518 = vmatpush3.bf16.msra.mxu1 %v4515_v46  ;;  %4042 = vmatprep.mubr.msk.f32.mxu1 %vm807_vm1, %v5470_v47 }
 0x162   : > { %v4519_v51 = vpack.c.bf16 %v3960_v48, %v778_v49 }
 0x164   : > { %v3963_v53 = vpop.f32.mrb[28].mxu0  ;;  %4043 = vmatmul.mubr.msk.f32.gmra.mrb[18].mxu1 %vm807_vm1, %v5477_v50  ;;  %4520 = vmatprep.subr.bf16.mxu1 %v4519_v51 }
 0x165   : > { %v788_v54 = vpop.f32.mrb[29].mxu0  ;;  %4522 = vmatpush3.bf16.msra.mxu1 %v4519_v51  ;;  %4045 = vmatprep.mubr.msk.f32.mxu1 %vm807_vm1, %v5480_v52 }
 0x166   : > { %v4523_v56 = vpack.c.bf16 %v3963_v53, %v788_v54 }
 0x168   : > { %v3966_v58 = vpop.f32.mrb[30].mxu0  ;;  %4046 = vmatmul.mubr.msk.f32.gmra.mrb[20].mxu1 %vm807_vm1, %v5487_v55  ;;  %4524 = vmatprep.subr.bf16.mxu1 %v4523_v56 }
 0x169   : > { %v798_v59 = vpop.f32.mrb[31].mxu0  ;;  %4526 = vmatpush3.bf16.msra.mxu1 %v4523_v56  ;;  %4048 = vmatprep.mubr.msk.f32.mxu1 %vm807_vm1, %v5490_v57 }
 0x16a   : > { %v4527_v61 = vpack.c.bf16 %v3966_v58, %v798_v59 }
 0x16c   : > { %4049 = vmatmul.mubr.msk.f32.gmra.mrb[22].mxu1 %vm807_vm1, %v5497_v60  ;;  %4528 = vmatprep.subr.bf16.mxu1 %v4527_v61 }
 0x16d   : > { %4530 = vmatpush3.bf16.msra.mxu1 %v4527_v61  ;;  %4067 = vmatprep.mubr.msk.f32.mxu1 %vm807_vm1, %v5500_v62 }
 0x170   : > { %4068 = vmatmul.mubr.msk.f32.vlgmr.msra.gmra.mrb[24].mxu1 %vm807_vm1, %v5507_v63 }
 0x171   : > { %4070 = vmatprep.mubr.msk.f32.mxu1 %vm807_vm1, %v5510_v0 }
 0x174   : > { %4071 = vmatmul.mubr.msk.f32.gmra.mrb[26].mxu1 %vm807_vm1, %v5517_v1 }
 0x175   : > { %4073 = vmatprep.mubr.msk.f32.mxu1 %vm807_vm1, %v5520_v2 }
 0x178   : > { %4074 = vmatmul.mubr.msk.f32.gmra.mrb[28].mxu1 %vm807_vm1, %v5527_v3 }
 0x179   : > { %4076 = vmatprep.mubr.msk.f32.mxu1 %vm807_vm1, %v5530_v5 }
 0x17c   : > { %4077 = vmatmul.mubr.msk.f32.gmra.mrb[30].mxu1 %vm807_vm1, %v5537_v7 }
 0x17d   : > { %4175 = vmatprep.mubr.msk.f32.mxu1 %vm807_vm1, %v5346_v35 }
 0x213   : > { %v3985_v20 = vpop.f32.mrb[0].mxu1 }
 0x214   : > { %v1332_v23 = vmul.f32 %v3985_v20, %v5558_v18  ;;  %v898_v25 = vpop.f32.mrb[1].mxu1 }
 0x215   : > { %v1331_v27 = vmul.f32 %v5558_v18, %v898_v25 }
 0x216   : > { %v1371_v28 = vadd.f32 %v5563_v22, %v1332_v23 }
 0x217   : > { %v1370_v30 = vadd.f32 %v5563_v22, %v1331_v27  ;;  %v3988_v32 = vpop.f32.mrb[2].mxu1 }
 0x218   : > { %v1334_v33 = vmul.f32 %v3988_v32, %v5558_v18  ;;  %v908_v36 = vpop.f32.mrb[3].mxu1  ;;  %v1403_v41 = vmax.f32 %v1371_v28, 0.0 }
 0x219   : > { %v1402_v38 = vmax.f32 %v1370_v30, 0.0  ;;  %v1333_v39 = vmul.f32 %v5558_v18, %v908_v36 }
 0x21a   : > { %v1373_v43 = vadd.f32 %v5563_v22, %v1334_v33 }
 0x21b   : > { %v1372_v44 = vadd.f32 %v5563_v22, %v1333_v39  ;;  %v3991_v46 = vpop.f32.mrb[4].mxu1  ;;  %4111 = vmatprep.mubr.f32.mxu0 %v1402_v38 }
 0x21c   : > { %v1336_v48 = vmul.f32 %v3991_v46, %v5558_v18  ;;  %v918_v49 = vpop.f32.mrb[5].mxu1  ;;  %4112 = vmatmul.mubr.f32.vlgmr.msra.gmra.mrb[32].mxu0 %v1403_v41  ;;  %v1405_v54 = vmax.f32 %v1373_v43, 0.0 }
 0x21d   : > { %v1404_v51 = vmax.f32 %v1372_v44, 0.0  ;;  %v1335_v53 = vmul.f32 %v5558_v18, %v918_v49 }
 0x21e   : > { %v1375_v56 = vadd.f32 %v5563_v22, %v1336_v48 }
 0x21f   : > { %v1374_v58 = vadd.f32 %v5563_v22, %v1335_v53  ;;  %v3994_v59 = vpop.f32.mrb[6].mxu1  ;;  %4114 = vmatprep.mubr.f32.mxu0 %v1404_v51 }
 0x220   : > { %v1338_v61 = vmul.f32 %v3994_v59, %v5558_v18  ;;  %v928_v8 = vpop.f32.mrb[7].mxu1  ;;  %4115 = vmatmul.mubr.f32.gmra.mrb[34].mxu0 %v1405_v54  ;;  %v1407_v13 = vmax.f32 %v1375_v56, 0.0 }
 0x221   : > { %v1406_v10 = vmax.f32 %v1374_v58, 0.0  ;;  %v1337_v12 = vmul.f32 %v5558_v18, %v928_v8 }
 0x222   : > { %v1377_v15 = vadd.f32 %v5563_v22, %v1338_v61 }
 0x223   : > { %v1376_v17 = vadd.f32 %v5563_v22, %v1337_v12  ;;  %v4013_v20 = vpop.f32.mrb[8].mxu1  ;;  %4117 = vmatprep.mubr.f32.mxu0 %v1406_v10 }
 0x224   : > { %v1340_v23 = vmul.f32 %v4013_v20, %v5558_v18  ;;  %v1027_v25 = vpop.f32.mrb[9].mxu1  ;;  %4118 = vmatmul.mubr.f32.gmra.mrb[36].mxu0 %v1407_v13  ;;  %v1409_v30 = vmax.f32 %v1377_v15, 0.0 }
 0x225   : > { %v1408_v27 = vmax.f32 %v1376_v17, 0.0  ;;  %v1339_v28 = vmul.f32 %v5558_v18, %v1027_v25 }
 0x226   : > { %v1379_v32 = vadd.f32 %v5563_v22, %v1340_v23 }
 0x227   : > { %v1378_v33 = vadd.f32 %v5563_v22, %v1339_v28  ;;  %v4016_v36 = vpop.f32.mrb[10].mxu1  ;;  %4120 = vmatprep.mubr.f32.mxu0 %v1408_v27 }
 0x228   : > { %v1411_v38 = vmax.f32 %v1379_v32, 0.0  ;;  %v1342_v39 = vmul.f32 %v4016_v36, %v5558_v18  ;;  %v1037_v41 = vpop.f32.mrb[11].mxu1  ;;  %4121 = vmatmul.mubr.f32.gmra.mrb[38].mxu0 %v1409_v30 }
 0x229   : > { %v1410_v43 = vmax.f32 %v1378_v33, 0.0  ;;  %v1341_v44 = vmul.f32 %v5558_v18, %v1037_v41 }
 0x22a   : > { %v1381_v46 = vadd.f32 %v5563_v22, %v1342_v39 }
 0x22b   : > { %v1380_v48 = vadd.f32 %v5563_v22, %v1341_v44  ;;  %v4019_v49 = vpop.f32.mrb[12].mxu1  ;;  %4123 = vmatprep.mubr.f32.mxu0 %v1410_v43 }
 0x22c   : > { %v1413_v51 = vmax.f32 %v1381_v46, 0.0  ;;  %v1344_v53 = vmul.f32 %v4019_v49, %v5558_v18  ;;  %v1047_v54 = vpop.f32.mrb[13].mxu1  ;;  %4124 = vmatmul.mubr.f32.gmra.mrb[40].mxu0 %v1411_v38 }
 0x22d   : > { %v1412_v56 = vmax.f32 %v1380_v48, 0.0  ;;  %v1343_v58 = vmul.f32 %v5558_v18, %v1047_v54 }
 0x22e   : > { %v1383_v59 = vadd.f32 %v5563_v22, %v1344_v53 }
 0x22f   : > { %v1382_v61 = vadd.f32 %v5563_v22, %v1343_v58  ;;  %v4022_v8 = vpop.f32.mrb[14].mxu1  ;;  %4126 = vmatprep.mubr.f32.mxu0 %v1412_v56 }
 0x230   : > { %v1415_v10 = vmax.f32 %v1383_v59, 0.0  ;;  %v1346_v12 = vmul.f32 %v4022_v8, %v5558_v18  ;;  %v1057_v13 = vpop.f32.mrb[15].mxu1  ;;  %4127 = vmatmul.mubr.f32.gmra.mrb[42].mxu0 %v1413_v51 }
 0x231   : > { %v1414_v15 = vmax.f32 %v1382_v61, 0.0  ;;  %v1345_v17 = vmul.f32 %v5558_v18, %v1057_v13 }
 0x232   : > { %v1385_v20 = vadd.f32 %v5563_v22, %v1346_v12 }
 0x233   : > { %v1384_v23 = vadd.f32 %v5563_v22, %v1345_v17  ;;  %v4041_v25 = vpop.f32.mrb[16].mxu1  ;;  %4129 = vmatprep.mubr.f32.mxu0 %v1414_v15 }
 0x234   : > { %v1417_v27 = vmax.f32 %v1385_v20, 0.0  ;;  %v1348_v28 = vmul.f32 %v4041_v25, %v5558_v18  ;;  %v1156_v30 = vpop.f32.mrb[17].mxu1  ;;  %4130 = vmatmul.mubr.f32.gmra.mrb[44].mxu0 %v1415_v10 }
 0x235   : > { %v1416_v32 = vmax.f32 %v1384_v23, 0.0  ;;  %v1347_v33 = vmul.f32 %v5558_v18, %v1156_v30 }
 0x236   : > { %v1387_v36 = vadd.f32 %v5563_v22, %v1348_v28 }
 0x237   : > { %v1386_v38 = vadd.f32 %v5563_v22, %v1347_v33  ;;  %v4044_v39 = vpop.f32.mrb[18].mxu1  ;;  %4132 = vmatprep.mubr.f32.mxu0 %v1416_v32 }
 0x238   : > { %v1419_v41 = vmax.f32 %v1387_v36, 0.0  ;;  %v1350_v43 = vmul.f32 %v4044_v39, %v5558_v18  ;;  %v1166_v44 = vpop.f32.mrb[19].mxu1  ;;  %4133 = vmatmul.mubr.f32.gmra.mrb[46].mxu0 %v1417_v27 }
 0x239   : > { %v1418_v46 = vmax.f32 %v1386_v38, 0.0  ;;  %v1349_v48 = vmul.f32 %v5558_v18, %v1166_v44 }
 0x23a   : > { %v1389_v49 = vadd.f32 %v5563_v22, %v1350_v43 }
 0x23b   : > { %v1388_v51 = vadd.f32 %v5563_v22, %v1349_v48  ;;  %v4047_v53 = vpop.f32.mrb[20].mxu1  ;;  %4135 = vmatprep.mubr.f32.mxu0 %v1418_v46 }
 0x23c   : > { %v1421_v54 = vmax.f32 %v1389_v49, 0.0  ;;  %v1352_v56 = vmul.f32 %v4047_v53, %v5558_v18  ;;  %v1176_v58 = vpop.f32.mrb[21].mxu1  ;;  %4136 = vmatmul.mubr.f32.gmra.mrb[48].mxu0 %v1419_v41 }
 0x23d   : > { %v1420_v59 = vmax.f32 %v1388_v51, 0.0  ;;  %v1351_v61 = vmul.f32 %v5558_v18, %v1176_v58 }
 0x23e   : > { %v1391_v8 = vadd.f32 %v5563_v22, %v1352_v56 }
 0x23f   : > { %v1390_v10 = vadd.f32 %v5563_v22, %v1351_v61  ;;  %v4050_v12 = vpop.f32.mrb[22].mxu1  ;;  %4138 = vmatprep.mubr.f32.mxu0 %v1420_v59 }
 0x240   : > { %v1423_v13 = vmax.f32 %v1391_v8, 0.0  ;;  %v1354_v15 = vmul.f32 %v4050_v12, %v5558_v18  ;;  %v1186_v17 = vpop.f32.mrb[23].mxu1  ;;  %4139 = vmatmul.mubr.f32.gmra.mrb[50].mxu0 %v1421_v54 }
 0x241   : > { %v1422_v20 = vmax.f32 %v1390_v10, 0.0  ;;  %v1353_v23 = vmul.f32 %v5558_v18, %v1186_v17 }
 0x242   : > { %v1393_v25 = vadd.f32 %v5563_v22, %v1354_v15 }
 0x243   : > { %v1392_v27 = vadd.f32 %v5563_v22, %v1353_v23  ;;  %v4069_v28 = vpop.f32.mrb[24].mxu1  ;;  %4141 = vmatprep.mubr.f32.mxu0 %v1422_v20 }
 0x244   : > { %v1425_v30 = vmax.f32 %v1393_v25, 0.0  ;;  %v1356_v32 = vmul.f32 %v4069_v28, %v5558_v18  ;;  %v1285_v33 = vpop.f32.mrb[25].mxu1  ;;  %4142 = vmatmul.mubr.f32.gmra.mrb[52].mxu0 %v1423_v13 }
 0x245   : > { %v1424_v36 = vmax.f32 %v1392_v27, 0.0  ;;  %v1355_v38 = vmul.f32 %v5558_v18, %v1285_v33 }
 0x246   : > { %v1395_v39 = vadd.f32 %v5563_v22, %v1356_v32 }
 0x247   : > { %v1394_v41 = vadd.f32 %v5563_v22, %v1355_v38  ;;  %v4072_v43 = vpop.f32.mrb[26].mxu1  ;;  %4144 = vmatprep.mubr.f32.mxu0 %v1424_v36  ;;  %v2205_v36 = vld [vmem:[#allocation5] sm:$0xff]  ;;  %v2206_v38 = vld [vmem:[#allocation5 + $0x8] sm:$0xff] }
 0x248   : > { %v1427_v44 = vmax.f32 %v1395_v39, 0.0  ;;  %v1358_v46 = vmul.f32 %v4072_v43, %v5558_v18  ;;  %v1295_v48 = vpop.f32.mrb[27].mxu1  ;;  %4145 = vmatmul.mubr.f32.gmra.mrb[54].mxu0 %v1425_v30  ;;  %v2207_v39 = vld [vmem:[#allocation5 + $0x10] sm:$0xff]  ;;  %v2208_v43 = vld [vmem:[#allocation5 + $0x18] sm:$0xff] }
 0x249   : > { %v1426_v49 = vmax.f32 %v1394_v41, 0.0  ;;  %v1357_v51 = vmul.f32 %v5558_v18, %v1295_v48  ;;  %v4627_v41 = vpack.c.bf16 %v2206_v38, %v2205_v36  ;;  %v2210_v48 = vld [vmem:[#allocation5 + $0x28] sm:$0xff] }
 0x24a   : > { %v1397_v53 = vadd.f32 %v5563_v22, %v1358_v46  ;;  %v2209_v46 = vld [vmem:[#allocation5 + $0x20] sm:$0xff] }
 0x24b   : > { %v1396_v54 = vadd.f32 %v5563_v22, %v1357_v51  ;;  %v4075_v56 = vpop.f32.mrb[28].mxu1  ;;  %4147 = vmatprep.mubr.f32.mxu0 %v1426_v49  ;;  %4628 = vmatprep.subr.bf16.mxu0 %v4627_v41  ;;  %v2211_v49 = vld [vmem:[#allocation5 + $0x30] sm:$0xff] }
 0x24c   : > { %v1429_v58 = vmax.f32 %v1397_v53, 0.0  ;;  %v1360_v59 = vmul.f32 %v4075_v56, %v5558_v18  ;;  %v1305_v61 = vpop.f32.mrb[29].mxu1  ;;  %4148 = vmatmul.mubr.f32.gmra.mrb[56].mxu0 %v1427_v44  ;;  %v4631_v44 = vpack.c.bf16 %v2208_v43, %v2207_v39  ;;  %v2213_v53 = vld [vmem:[#allocation5 + $0x40] sm:$0xff] }
 0x24d   : > { %v1428_v8 = vmax.f32 %v1396_v54, 0.0  ;;  %v1359_v10 = vmul.f32 %v5558_v18, %v1305_v61  ;;  %4630 = vmatpush3.bf16.msra.mxu0 %v4627_v41  ;;  %v2214_v54 = vld [vmem:[#allocation5 + $0x48] sm:$0xff] }
 0x24e   : > { %v1399_v12 = vadd.f32 %v5563_v22, %v1360_v59  ;;  %4632 = vmatprep.subr.bf16.mxu0 %v4631_v44  ;;  %v4643_v56 = vpack.c.bf16 %v2214_v54, %v2213_v53  ;;  %v2216_v59 = vld [vmem:[#allocation5 + $0x58] sm:$0xff] }
 0x24f   : > { %v1398_v13 = vadd.f32 %v5563_v22, %v1359_v10  ;;  %v4078_v15 = vpop.f32.mrb[30].mxu1  ;;  %4150 = vmatprep.mubr.f32.mxu0 %v1428_v8 }
 0x250   : > { %v1431_v17 = vmax.f32 %v1399_v12, 0.0  ;;  %v1362_v20 = vmul.f32 %v4078_v15, %v5558_v18  ;;  %v1315_v23 = vpop.f32.mrb[31].mxu1  ;;  %4151 = vmatmul.mubr.f32.gmra.mrb[58].mxu0 %v1429_v58  ;;  %v2215_v58 = vld [vmem:[#allocation5 + $0x50] sm:$0xff] }
 0x251   : > { %v1430_v25 = vmax.f32 %v1398_v13, 0.0  ;;  %v1361_v27 = vmul.f32 %v5558_v18, %v1315_v23  ;;  %v4635_v18 = vpack.c.bf16 %v2210_v48, %v2209_v46  ;;  %4634 = vmatpush3.bf16.msra.mxu0 %v4631_v44  ;;  %v4647_v61 = vpack.c.bf16 %v2216_v59, %v2215_v58 }
 0x252   : > { %v1401_v28 = vadd.f32 %v5563_v22, %v1362_v20 }
 0x253   : > { %v1400_v30 = vadd.f32 %v5563_v22, %v1361_v27  ;;  %4153 = vmatprep.mubr.f32.mxu0 %v1430_v25  ;;  %v2212_v22 = vld [vmem:[#allocation5 + $0x38] sm:$0xff]  ;;  %4636 = vmatprep.subr.bf16.mxu0 %v4635_v18 }
 0x254   : > { %v1433_v32 = vmax.f32 %v1401_v28, 0.0  ;;  %4154 = vmatmul.mubr.f32.gmra.mrb[60].mxu0 %v1431_v17  ;;  %v4639_v51 = vpack.c.bf16 %v2212_v22, %v2211_v49 }
 0x255   : > { %v1432_v33 = vmax.f32 %v1400_v30, 0.0  ;;  %4638 = vmatpush3.bf16.msra.mxu0 %v4635_v18 }
 0x256   : > { %4640 = vmatprep.subr.bf16.mxu0 %v4639_v51 }
 0x257   : > { %4156 = vmatprep.mubr.f32.mxu0 %v1432_v33 }
 0x258   : > { %4157 = vmatmul.mubr.f32.gmra.mrb[62].mxu0 %v1433_v32 }
 0x259   : > { %4642 = vmatpush3.bf16.msra.mxu0 %v4639_v51 }
 0x25a   : > { %4644 = vmatprep.subr.bf16.mxu0 %v4643_v56 }
 0x25d   : > { %4646 = vmatpush3.bf16.msra.mxu0 %v4643_v56 }
 0x25e   : > { %4648 = vmatprep.subr.bf16.mxu0 %v4647_v61 }
 0x261   : > { %4650 = vmatpush3.bf16.msra.mxu0 %v4647_v61 }
 0x2ef   : > { %v4113_v8 = vpop.f32.mrb[32].mxu0 }
 0x2f0   : > { %v1516_v10 = vpop.f32.mrb[33].mxu0 }
 0x2f1   : > { %v4563_v12 = vpack.c.bf16 %v4113_v8, %v1516_v10 }
 0x2f3   : > { %v4116_v13 = vpop.f32.mrb[34].mxu0  ;;  %4564 = vmatprep.subr.bf16.mxu1 %v4563_v12 }
 0x2f4   : > { %v1526_v15 = vpop.f32.mrb[35].mxu0  ;;  %4566 = vmatpush3.bf16.msra.mxu1 %v4563_v12 }
 0x2f5   : > { %v4567_v17 = vpack.c.bf16 %v4116_v13, %v1526_v15 }
 0x2f7   : > { %v4119_v20 = vpop.f32.mrb[36].mxu0  ;;  %4568 = vmatprep.subr.bf16.mxu1 %v4567_v17 }
 0x2f8   : > { %v1536_v23 = vpop.f32.mrb[37].mxu0  ;;  %4570 = vmatpush3.bf16.msra.mxu1 %v4567_v17 }
 0x2f9   : > { %v4571_v25 = vpack.c.bf16 %v4119_v20, %v1536_v23 }
 0x2fb   : > { %v4122_v27 = vpop.f32.mrb[38].mxu0  ;;  %4572 = vmatprep.subr.bf16.mxu1 %v4571_v25 }
 0x2fc   : > { %v1546_v28 = vpop.f32.mrb[39].mxu0  ;;  %4574 = vmatpush3.bf16.msra.mxu1 %v4571_v25 }
 0x2fd   : > { %v4575_v30 = vpack.c.bf16 %v4122_v27, %v1546_v28 }
 0x2ff   : > { %v4125_v32 = vpop.f32.mrb[40].mxu0  ;;  %4576 = vmatprep.subr.bf16.mxu1 %v4575_v30 }
 0x300   : > { %v1556_v33 = vpop.f32.mrb[41].mxu0  ;;  %4578 = vmatpush3.bf16.msra.mxu1 %v4575_v30 }
 0x301   : > { %v4579_v36 = vpack.c.bf16 %v4125_v32, %v1556_v33 }
 0x303   : > { %v4128_v38 = vpop.f32.mrb[42].mxu0  ;;  %4176 = vmatmul.mubr.msk.f32.vlgmr.msra.gmra.mrb[32].mxu1 %vm807_vm1, %v5387_v4  ;;  %4580 = vmatprep.subr.bf16.mxu1 %v4579_v36 }
 0x304   : > { %v1566_v39 = vpop.f32.mrb[43].mxu0  ;;  %4582 = vmatpush3.bf16.msra.mxu1 %v4579_v36  ;;  %4178 = vmatprep.mubr.msk.f32.mxu1 %vm807_vm1, %v5390_v6 }
 0x305   : > { %v4583_v41 = vpack.c.bf16 %v4128_v38, %v1566_v39 }
 0x307   : > { %v4131_v43 = vpop.f32.mrb[44].mxu0  ;;  %4179 = vmatmul.mubr.msk.f32.gmra.mrb[34].mxu1 %vm807_vm1, %v5397_v9  ;;  %4584 = vmatprep.subr.bf16.mxu1 %v4583_v41 }
 0x308   : > { %v1576_v44 = vpop.f32.mrb[45].mxu0  ;;  %4586 = vmatpush3.bf16.msra.mxu1 %v4583_v41  ;;  %4181 = vmatprep.mubr.msk.f32.mxu1 %vm807_vm1, %v5400_v11 }
 0x309   : > { %v4587_v46 = vpack.c.bf16 %v4131_v43, %v1576_v44 }
 0x30b   : > { %v4134_v48 = vpop.f32.mrb[46].mxu0  ;;  %4182 = vmatmul.mubr.msk.f32.gmra.mrb[36].mxu1 %vm807_vm1, %v5407_v14  ;;  %4588 = vmatprep.subr.bf16.mxu1 %v4587_v46 }
 0x30c   : > { %v1586_v4 = vpop.f32.mrb[47].mxu0  ;;  %4590 = vmatpush3.bf16.msra.mxu1 %v4587_v46  ;;  %4184 = vmatprep.mubr.msk.f32.mxu1 %vm807_vm1, %v5410_v16 }
 0x30d   : > { %v4591_v6 = vpack.c.bf16 %v4134_v48, %v1586_v4 }
 0x30f   : > { %v4137_v18 = vpop.f32.mrb[48].mxu0  ;;  %4185 = vmatmul.mubr.msk.f32.gmra.mrb[38].mxu1 %vm807_vm1, %v5417_v19  ;;  %4592 = vmatprep.subr.bf16.mxu1 %v4591_v6 }
 0x310   : > { %v1596_v9 = vpop.f32.mrb[49].mxu0  ;;  %4594 = vmatpush3.bf16.msra.mxu1 %v4591_v6  ;;  %4203 = vmatprep.mubr.msk.f32.mxu1 %vm807_vm1, %v5420_v21 }
 0x311   : > { %v4595_v11 = vpack.c.bf16 %v4137_v18, %v1596_v9 }
 0x313   : > { %v4140_v49 = vpop.f32.mrb[50].mxu0  ;;  %4204 = vmatmul.mubr.msk.f32.vlgmr.msra.gmra.mrb[40].mxu1 %vm807_vm1, %v5427_v24  ;;  %4596 = vmatprep.subr.bf16.mxu1 %v4595_v11 }
 0x314   : > { %v1606_v14 = vpop.f32.mrb[51].mxu0  ;;  %4598 = vmatpush3.bf16.msra.mxu1 %v4595_v11  ;;  %4206 = vmatprep.mubr.msk.f32.mxu1 %vm807_vm1, %v5430_v26 }
 0x315   : > { %v4599_v16 = vpack.c.bf16 %v4140_v49, %v1606_v14 }
 0x317   : > { %v4143_v22 = vpop.f32.mrb[52].mxu0  ;;  %4207 = vmatmul.mubr.msk.f32.gmra.mrb[42].mxu1 %vm807_vm1, %v5437_v29  ;;  %4600 = vmatprep.subr.bf16.mxu1 %v4599_v16 }
 0x318   : > { %v1616_v19 = vpop.f32.mrb[53].mxu0  ;;  %4602 = vmatpush3.bf16.msra.mxu1 %v4599_v16  ;;  %4209 = vmatprep.mubr.msk.f32.mxu1 %vm807_vm1, %v5440_v31 }
 0x319   : > { %v4603_v21 = vpack.c.bf16 %v4143_v22, %v1616_v19 }
 0x31b   : > { %v4146_v51 = vpop.f32.mrb[54].mxu0  ;;  %4210 = vmatmul.mubr.msk.f32.gmra.mrb[44].mxu1 %vm807_vm1, %v5447_v34  ;;  %4604 = vmatprep.subr.bf16.mxu1 %v4603_v21 }
 0x31c   : > { %v1626_v24 = vpop.f32.mrb[55].mxu0  ;;  %4606 = vmatpush3.bf16.msra.mxu1 %v4603_v21  ;;  %4212 = vmatprep.mubr.msk.f32.mxu1 %vm807_vm1, %v5450_v37 }
 0x31d   : > { %v4607_v26 = vpack.c.bf16 %v4146_v51, %v1626_v24 }
 0x31f   : > { %v4149_v53 = vpop.f32.mrb[56].mxu0  ;;  %4213 = vmatmul.mubr.msk.f32.gmra.mrb[46].mxu1 %vm807_vm1, %v5457_v40  ;;  %4608 = vmatprep.subr.bf16.mxu1 %v4607_v26 }
 0x320   : > { %v1636_v29 = vpop.f32.mrb[57].mxu0  ;;  %4610 = vmatpush3.bf16.msra.mxu1 %v4607_v26  ;;  %4231 = vmatprep.mubr.msk.f32.mxu1 %vm807_vm1, %v5460_v42 }
 0x321   : > { %v4611_v31 = vpack.c.bf16 %v4149_v53, %v1636_v29 }
 0x323   : > { %v4152_v54 = vpop.f32.mrb[58].mxu0  ;;  %4232 = vmatmul.mubr.msk.f32.vlgmr.msra.gmra.mrb[48].mxu1 %vm807_vm1, %v5467_v45  ;;  %4612 = vmatprep.subr.bf16.mxu1 %v4611_v31 }
 0x324   : > { %v1646_v34 = vpop.f32.mrb[59].mxu0  ;;  %4614 = vmatpush3.bf16.msra.mxu1 %v4611_v31  ;;  %4234 = vmatprep.mubr.msk.f32.mxu1 %vm807_vm1, %v5470_v47 }
 0x325   : > { %v4615_v37 = vpack.c.bf16 %v4152_v54, %v1646_v34 }
 0x327   : > { %v4155_v56 = vpop.f32.mrb[60].mxu0  ;;  %4235 = vmatmul.mubr.msk.f32.gmra.mrb[50].mxu1 %vm807_vm1, %v5477_v50  ;;  %4616 = vmatprep.subr.bf16.mxu1 %v4615_v37  ;;  %v2217_v50 = vld [vmem:[#allocation5 + $0x60] sm:$0xff] }
 0x328   : > { %v1656_v40 = vpop.f32.mrb[61].mxu0  ;;  %4618 = vmatpush3.bf16.msra.mxu1 %v4615_v37  ;;  %4237 = vmatprep.mubr.msk.f32.mxu1 %vm807_vm1, %v5480_v52  ;;  %v2218_v52 = vld [vmem:[#allocation5 + $0x68] sm:$0xff] }
 0x329   : > { %v4619_v42 = vpack.c.bf16 %v4155_v56, %v1656_v40 }
 0x32b   : > { %v4158_v58 = vpop.f32.mrb[62].mxu0  ;;  %4238 = vmatmul.mubr.msk.f32.gmra.mrb[52].mxu1 %vm807_vm1, %v5487_v55  ;;  %4620 = vmatprep.subr.bf16.mxu1 %v4619_v42  ;;  %v4651_v55 = vpack.c.bf16 %v2218_v52, %v2217_v50 }
 0x32c   : > { %v1666_v45 = vpop.f32.mrb[63].mxu0  ;;  %4622 = vmatpush3.bf16.msra.mxu1 %v4619_v42  ;;  %4240 = vmatprep.mubr.msk.f32.mxu1 %vm807_vm1, %v5490_v57  ;;  %v2219_v57 = vld [vmem:[#allocation5 + $0x70] sm:$0xff] }
 0x32d   : > { %v4623_v47 = vpack.c.bf16 %v4158_v58, %v1666_v45  ;;  %4652 = vmatprep.subr.bf16.mxu0 %v4651_v55 }
 0x32e   : > { %4654 = vmatpush3.bf16.msra.mxu0 %v4651_v55 }
 0x32f   : > { %4241 = vmatmul.mubr.msk.f32.gmra.mrb[54].mxu1 %vm807_vm1, %v5497_v60  ;;  %4624 = vmatprep.subr.bf16.mxu1 %v4623_v47  ;;  %v2220_v60 = vld [vmem:[#allocation5 + $0x78] sm:$0xff] }
 0x330   : > { %4626 = vmatpush3.bf16.msra.mxu1 %v4623_v47  ;;  %4259 = vmatprep.mubr.msk.f32.mxu1 %vm807_vm1, %v5500_v62 }
 0x333   : > { %4260 = vmatmul.mubr.msk.f32.vlgmr.msra.gmra.mrb[56].mxu1 %vm807_vm1, %v5507_v63  ;;  %v4655_v63 = vpack.c.bf16 %v2220_v60, %v2219_v57 }
 0x334   : > { %4262 = vmatprep.mubr.msk.f32.mxu1 %vm807_vm1, %v5510_v0  ;;  %v5696_v0 = vld [vmem:[%s6348_s6] ss:$0 sm:$0xff] }
 0x335   : > { %4656 = vmatprep.subr.bf16.mxu0 %v4655_v63 }
 0x336   : > { %4658 = vmatpush3.bf16.msra.mxu0 %v4655_v63 }
 0x337   : > { %4263 = vmatmul.mubr.msk.f32.gmra.mrb[58].mxu1 %vm807_vm1, %v5517_v1 }
 0x338   : > { %4265 = vmatprep.mubr.msk.f32.mxu1 %vm807_vm1, %v5520_v2 }
 0x33b   : > { %4266 = vmatmul.mubr.msk.f32.gmra.mrb[60].mxu1 %vm807_vm1, %v5527_v3 }
 0x33c   : > { %4268 = vmatprep.mubr.msk.f32.mxu1 %vm807_vm1, %v5530_v5 }
 0x33f   : > { %4269 = vmatmul.mubr.msk.f32.gmra.mrb[62].mxu1 %vm807_vm1, %v5537_v7 }
 0x340   : > { %4367 = vmatprep.mubr.msk.f32.mxu1 %vm807_vm1, %v5346_v35  ;;  %v5701_v35 = vld [vmem:[%s6350_s8] ss:$0 sm:$0xff] }
 0x3d6   : > { %v4177_v1 = vpop.f32.mrb[32].mxu1 }
 0x3d7   : > { %v2103_v2 = vmul.f32 %v4177_v1, %v5696_v0  ;;  %v1741_v3 = vpop.f32.mrb[33].mxu1 }
 0x3d8   : > { %v2102_v5 = vmul.f32 %v5696_v0, %v1741_v3 }
 0x3d9   : > { %v2142_v7 = vadd.f32 %v5701_v35, %v2103_v2 }
 0x3da   : > { %v2141_v59 = vadd.f32 %v5701_v35, %v2102_v5  ;;  %v4180_v61 = vpop.f32.mrb[34].mxu1 }
 0x3db   : > { %v2105_v8 = vmul.f32 %v4180_v61, %v5696_v0  ;;  %v1751_v10 = vpop.f32.mrb[35].mxu1  ;;  %v2174_v15 = vmax.f32 %v2142_v7, 0.0 }
 0x3dc   : > { %v2173_v12 = vmax.f32 %v2141_v59, 0.0  ;;  %v2104_v13 = vmul.f32 %v5696_v0, %v1751_v10 }
 0x3dd   : > { %v2144_v17 = vadd.f32 %v5701_v35, %v2105_v8 }
 0x3de   : > { %v2143_v20 = vadd.f32 %v5701_v35, %v2104_v13  ;;  %v4183_v23 = vpop.f32.mrb[36].mxu1  ;;  %4303 = vmatprep.mubr.f32.mxu0 %v2173_v12 }
 0x3df   : > { %v2107_v25 = vmul.f32 %v4183_v23, %v5696_v0  ;;  %v1761_v27 = vpop.f32.mrb[37].mxu1  ;;  %4304 = vmatmul.mubr.f32.vlgmr.msra.gmra.mrb[64].mxu0 %v2174_v15  ;;  %v2176_v32 = vmax.f32 %v2144_v17, 0.0 }
 0x3e0   : > { %v2175_v28 = vmax.f32 %v2143_v20, 0.0  ;;  %v2106_v30 = vmul.f32 %v5696_v0, %v1761_v27 }
 0x3e1   : > { %v2146_v33 = vadd.f32 %v5701_v35, %v2107_v25 }
 0x3e2   : > { %v2145_v36 = vadd.f32 %v5701_v35, %v2106_v30  ;;  %v4186_v38 = vpop.f32.mrb[38].mxu1  ;;  %4306 = vmatprep.mubr.f32.mxu0 %v2175_v28 }
 0x3e3   : > { %v2109_v39 = vmul.f32 %v4186_v38, %v5696_v0  ;;  %v1771_v41 = vpop.f32.mrb[39].mxu1  ;;  %4307 = vmatmul.mubr.f32.gmra.mrb[66].mxu0 %v2176_v32  ;;  %v2178_v46 = vmax.f32 %v2146_v33, 0.0 }
 0x3e4   : > { %v2177_v43 = vmax.f32 %v2145_v36, 0.0  ;;  %v2108_v44 = vmul.f32 %v5696_v0, %v1771_v41 }
 0x3e5   : > { %v2148_v48 = vadd.f32 %v5701_v35, %v2109_v39 }
 0x3e6   : > { %v2147_v4 = vadd.f32 %v5701_v35, %v2108_v44  ;;  %v4205_v6 = vpop.f32.mrb[40].mxu1  ;;  %4309 = vmatprep.mubr.f32.mxu0 %v2177_v43 }
 0x3e7   : > { %v2111_v18 = vmul.f32 %v4205_v6, %v5696_v0  ;;  %v1846_v9 = vpop.f32.mrb[41].mxu1  ;;  %4310 = vmatmul.mubr.f32.gmra.mrb[68].mxu0 %v2178_v46  ;;  %v2180_v14 = vmax.f32 %v2148_v48, 0.0 }
 0x3e8   : > { %v2179_v11 = vmax.f32 %v2147_v4, 0.0  ;;  %v2110_v49 = vmul.f32 %v5696_v0, %v1846_v9 }
 0x3e9   : > { %v2150_v16 = vadd.f32 %v5701_v35, %v2111_v18 }
 0x3ea   : > { %v2149_v22 = vadd.f32 %v5701_v35, %v2110_v49  ;;  %v4208_v19 = vpop.f32.mrb[42].mxu1  ;;  %4312 = vmatprep.mubr.f32.mxu0 %v2179_v11 }
 0x3eb   : > { %v2182_v21 = vmax.f32 %v2150_v16, 0.0  ;;  %v2113_v51 = vmul.f32 %v4208_v19, %v5696_v0  ;;  %v1856_v24 = vpop.f32.mrb[43].mxu1  ;;  %4313 = vmatmul.mubr.f32.gmra.mrb[70].mxu0 %v2180_v14 }
 0x3ec   : > { %v2181_v26 = vmax.f32 %v2149_v22, 0.0  ;;  %v2112_v53 = vmul.f32 %v5696_v0, %v1856_v24 }
 0x3ed   : > { %v2152_v29 = vadd.f32 %v5701_v35, %v2113_v51 }
 0x3ee   : > { %v2151_v31 = vadd.f32 %v5701_v35, %v2112_v53  ;;  %v4211_v54 = vpop.f32.mrb[44].mxu1  ;;  %4315 = vmatprep.mubr.f32.mxu0 %v2181_v26 }
 0x3ef   : > { %v2184_v34 = vmax.f32 %v2152_v29, 0.0  ;;  %v2115_v37 = vmul.f32 %v4211_v54, %v5696_v0  ;;  %v1866_v56 = vpop.f32.mrb[45].mxu1  ;;  %4316 = vmatmul.mubr.f32.gmra.mrb[72].mxu0 %v2182_v21 }
 0x3f0   : > { %v2183_v40 = vmax.f32 %v2151_v31, 0.0  ;;  %v2114_v42 = vmul.f32 %v5696_v0, %v1866_v56 }
 0x3f1   : > { %v2154_v58 = vadd.f32 %v5701_v35, %v2115_v37 }
 0x3f2   : > { %v2153_v45 = vadd.f32 %v5701_v35, %v2114_v42  ;;  %v4214_v47 = vpop.f32.mrb[46].mxu1  ;;  %4318 = vmatprep.mubr.f32.mxu0 %v2183_v40 }
 0x3f3   : > { %v2186_v50 = vmax.f32 %v2154_v58, 0.0  ;;  %v2117_v52 = vmul.f32 %v4214_v47, %v5696_v0  ;;  %v1876_v55 = vpop.f32.mrb[47].mxu1  ;;  %4319 = vmatmul.mubr.f32.gmra.mrb[74].mxu0 %v2184_v34 }
 0x3f4   : > { %v2185_v57 = vmax.f32 %v2153_v45, 0.0  ;;  %v2116_v60 = vmul.f32 %v5696_v0, %v1876_v55 }
 0x3f5   : > { %v2156_v63 = vadd.f32 %v5701_v35, %v2117_v52 }
 0x3f6   : > { %v2155_v1 = vadd.f32 %v5701_v35, %v2116_v60  ;;  %v4233_v2 = vpop.f32.mrb[48].mxu1  ;;  %4321 = vmatprep.mubr.f32.mxu0 %v2185_v57 }
 0x3f7   : > { %v2188_v3 = vmax.f32 %v2156_v63, 0.0  ;;  %v2119_v5 = vmul.f32 %v4233_v2, %v5696_v0  ;;  %v1951_v7 = vpop.f32.mrb[49].mxu1  ;;  %4322 = vmatmul.mubr.f32.gmra.mrb[76].mxu0 %v2186_v50 }
 0x3f8   : > { %v2187_v59 = vmax.f32 %v2155_v1, 0.0  ;;  %v2118_v61 = vmul.f32 %v5696_v0, %v1951_v7 }
 0x3f9   : > { %v2158_v8 = vadd.f32 %v5701_v35, %v2119_v5 }
 0x3fa   : > { %v2157_v10 = vadd.f32 %v5701_v35, %v2118_v61  ;;  %v4236_v12 = vpop.f32.mrb[50].mxu1  ;;  %4324 = vmatprep.mubr.f32.mxu0 %v2187_v59 }
 0x3fb   : > { %v2190_v13 = vmax.f32 %v2158_v8, 0.0  ;;  %v2121_v15 = vmul.f32 %v4236_v12, %v5696_v0  ;;  %v1961_v17 = vpop.f32.mrb[51].mxu1  ;;  %4325 = vmatmul.mubr.f32.gmra.mrb[78].mxu0 %v2188_v3 }
 0x3fc   : > { %v2189_v20 = vmax.f32 %v2157_v10, 0.0  ;;  %v2120_v23 = vmul.f32 %v5696_v0, %v1961_v17 }
 0x3fd   : > { %v2160_v25 = vadd.f32 %v5701_v35, %v2121_v15 }
 0x3fe   : > { %v2159_v27 = vadd.f32 %v5701_v35, %v2120_v23  ;;  %v4239_v28 = vpop.f32.mrb[52].mxu1  ;;  %4327 = vmatprep.mubr.f32.mxu0 %v2189_v20 }
 0x3ff   : > { %v2192_v30 = vmax.f32 %v2160_v25, 0.0  ;;  %v2123_v32 = vmul.f32 %v4239_v28, %v5696_v0  ;;  %v1971_v33 = vpop.f32.mrb[53].mxu1  ;;  %4328 = vmatmul.mubr.f32.gmra.mrb[80].mxu0 %v2190_v13 }
 0x400   : > { %v2191_v36 = vmax.f32 %v2159_v27, 0.0  ;;  %v2122_v38 = vmul.f32 %v5696_v0, %v1971_v33 }
 0x401   : > { %v2162_v39 = vadd.f32 %v5701_v35, %v2123_v32  ;;  %v4923_v32 = vld [vmem:[%s5343_s18 + $0x8] sm:$0xff] }
 0x402   : > { %v2161_v41 = vadd.f32 %v5701_v35, %v2122_v38  ;;  %v4242_v43 = vpop.f32.mrb[54].mxu1  ;;  %4330 = vmatprep.mubr.f32.mxu0 %v2191_v36  ;;  %v4924_v36 = vld [vmem:[%s5343_s18 + $0x10] sm:$0xff] }
 0x403   : > { %v2194_v44 = vmax.f32 %v2162_v39, 0.0  ;;  %v2125_v46 = vmul.f32 %v4242_v43, %v5696_v0  ;;  %v1981_v48 = vpop.f32.mrb[55].mxu1  ;;  %4331 = vmatmul.mubr.f32.gmra.mrb[82].mxu0 %v2192_v30 }
 0x404   : > { %v2193_v4 = vmax.f32 %v2161_v41, 0.0  ;;  %v2124_v6 = vmul.f32 %v5696_v0, %v1981_v48  ;;  %v4925_v41 = vld [vmem:[%s5343_s18 + $0x18] sm:$0xff] }
 0x405   : > { %v2164_v18 = vadd.f32 %v5701_v35, %v2125_v46 }
 0x406   : > { %v2163_v9 = vadd.f32 %v5701_v35, %v2124_v6  ;;  %v4261_v11 = vpop.f32.mrb[56].mxu1  ;;  %4333 = vmatprep.mubr.f32.mxu0 %v2193_v4  ;;  %v4927_v4 = vld [vmem:[%s5343_s18 + $0x28] sm:$0xff] }
 0x407   : > { %v2196_v49 = vmax.f32 %v2164_v18, 0.0  ;;  %v2127_v14 = vmul.f32 %v4261_v11, %v5696_v0  ;;  %v2056_v16 = vpop.f32.mrb[57].mxu1  ;;  %4334 = vmatmul.mubr.f32.gmra.mrb[84].mxu0 %v2194_v44  ;;  %v4926_v44 = vld [vmem:[%s5343_s18 + $0x20] sm:$0xff]  ;;  %v4928_v18 = vld [vmem:[%s5343_s18 + $0x30] sm:$0xff] }
 0x408   : > { %v2195_v22 = vmax.f32 %v2163_v9, 0.0  ;;  %v2126_v19 = vmul.f32 %v5696_v0, %v2056_v16  ;;  %v4930_v16 = vld [vmem:[%s5343_s18 + $0x40] sm:$0xff] }
 0x409   : > { %v2166_v21 = vadd.f32 %v5701_v35, %v2127_v14 }
 0x40a   : > { %v2165_v51 = vadd.f32 %v5701_v35, %v2126_v19  ;;  %v4264_v24 = vpop.f32.mrb[58].mxu1  ;;  %4336 = vmatprep.mubr.f32.mxu0 %v2195_v22 }
 0x40b   : > { %v2198_v26 = vmax.f32 %v2166_v21, 0.0  ;;  %v2129_v53 = vmul.f32 %v4264_v24, %v5696_v0  ;;  %v2066_v29 = vpop.f32.mrb[59].mxu1  ;;  %4337 = vmatmul.mubr.f32.gmra.mrb[86].mxu0 %v2196_v49  ;;  %v4929_v49 = vld [vmem:[%s5343_s18 + $0x38] sm:$0xff]  ;;  %v4931_v21 = vld [vmem:[%s5343_s18 + $0x48] sm:$0xff]  ;;  %v4932_v24 = vld [vmem:[%s5343_s18 + $0x50] sm:$0xff] }
 0x40c   : > { %v2197_v31 = vmax.f32 %v2165_v51, 0.0  ;;  %v2128_v54 = vmul.f32 %v5696_v0, %v2066_v29  ;;  %v4933_v29 = vld [vmem:[%s5343_s18 + $0x58] sm:$0xff] }
 0x40d   : > { %v2168_v34 = vadd.f32 %v5701_v35, %v2129_v53 }
 0x40e   : > { %v2167_v37 = vadd.f32 %v5701_v35, %v2128_v54  ;;  %v4267_v56 = vpop.f32.mrb[60].mxu1  ;;  %4339 = vmatprep.mubr.f32.mxu0 %v2197_v31  ;;  %v4934_v54 = vld [vmem:[%s5343_s18 + $0x60] sm:$0xff] }
 0x40f   : > { %v2200_v40 = vmax.f32 %v2168_v34, 0.0  ;;  %v2131_v42 = vmul.f32 %v4267_v56, %v5696_v0  ;;  %v2076_v58 = vpop.f32.mrb[61].mxu1  ;;  %4340 = vmatmul.mubr.f32.gmra.mrb[88].mxu0 %v2198_v26  ;;  %v4935_v56 = vld [vmem:[%s5343_s18 + $0x68] sm:$0xff] }
 0x410   : > { %v2199_v45 = vmax.f32 %v2167_v37, 0.0  ;;  %v2130_v47 = vmul.f32 %v5696_v0, %v2076_v58 }
 0x411   : > { %v2170_v50 = vadd.f32 %v5701_v35, %v2131_v42  ;;  %v4936_v42 = vld [vmem:[%s5343_s18 + $0x70] sm:$0xff] }
 0x412   : > { %v2169_v52 = vadd.f32 %v5701_v35, %v2130_v47  ;;  %v4270_v55 = vpop.f32.mrb[62].mxu1  ;;  %4342 = vmatprep.mubr.f32.mxu0 %v2199_v45  ;;  %v4937_v47 = vld [vmem:[%s5343_s18 + $0x78] sm:$0xff] }
 0x413   : > { %v2202_v57 = vmax.f32 %v2170_v50, 0.0  ;;  %v2133_v60 = vmul.f32 %v4270_v55, %v5696_v0  ;;  %v2086_v63 = vpop.f32.mrb[63].mxu1  ;;  %4343 = vmatmul.mubr.f32.gmra.mrb[90].mxu0 %v2200_v40 }
 0x414   : > { %v2201_v1 = vmax.f32 %v2169_v52, 0.0  ;;  %v2132_v2 = vmul.f32 %v5696_v0, %v2086_v63  ;;  %v4938_v52 = vld [vmem:[%s5343_s18 + $0x80] sm:$0xff] }
 0x415   : > { %v2172_v3 = vadd.f32 %v5701_v35, %v2133_v60  ;;  %v4939_v60 = vld [vmem:[%s5343_s18 + $0x88] sm:$0xff] }
 0x416   : > { %v2171_v5 = vadd.f32 %v5701_v35, %v2132_v2  ;;  %4345 = vmatprep.mubr.f32.mxu0 %v2201_v1  ;;  %v4940_v2 = vld [vmem:[%s5343_s18 + $0x90] sm:$0xff] }
 0x417   : > { %v2204_v7 = vmax.f32 %v2172_v3, 0.0  ;;  %4346 = vmatmul.mubr.f32.gmra.mrb[92].mxu0 %v2202_v57 }
 0x418   : > { %v2203_v59 = vmax.f32 %v2171_v5, 0.0  ;;  %v4941_v5 = vld [vmem:[%s5343_s18 + $0x98] sm:$0xff] }
 0x41a   : > { %4348 = vmatprep.mubr.f32.mxu0 %v2203_v59  ;;  %v4942_v59 = vld [vmem:[%s5343_s18 + $0xa0] sm:$0xff] }
 0x41b   : > { %4349 = vmatmul.mubr.f32.gmra.mrb[94].mxu0 %v2204_v7 }
 0x41c   : > { %4451 = vmatprep.mubr.msk.f32.mxu0 %vm807_vm1, %v5500_v62 }
 0x4b2   : > { %v4305_v61 = vpop.f32.mrb[64].mxu0 }
 0x4b3   : > { %v2287_v8 = vpop.f32.mrb[65].mxu0 }
 0x4b4   : > { %v4659_v10 = vpack.c.bf16 %v4305_v61, %v2287_v8 }
 0x4b6   : > { %v4308_v12 = vpop.f32.mrb[66].mxu0  ;;  %4660 = vmatprep.subr.bf16.mxu1 %v4659_v10 }
 0x4b7   : > { %v2297_v13 = vpop.f32.mrb[67].mxu0  ;;  %4662 = vmatpush3.bf16.msra.mxu1 %v4659_v10  ;;  %v4943_v10 = vld [vmem:[%s5343_s18 + $0xa8] sm:$0xff] }
 0x4b8   : > { %v4663_v0 = vpack.c.bf16 %v4308_v12, %v2297_v13  ;;  %v4944_v13 = vld [vmem:[%s5343_s18 + $0xb0] sm:$0xff] }
 0x4ba   : > { %v4311_v15 = vpop.f32.mrb[68].mxu0  ;;  %4664 = vmatprep.subr.bf16.mxu1 %v4663_v0 }
 0x4bb   : > { %v2307_v35 = vpop.f32.mrb[69].mxu0  ;;  %4666 = vmatpush3.bf16.msra.mxu1 %v4663_v0 }
 0x4bc   : > { %v4667_v17 = vpack.c.bf16 %v4311_v15, %v2307_v35  ;;  %v4945_v15 = vld [vmem:[%s5343_s18 + $0xb8] sm:$0xff]  ;;  %v4946_v35 = vld [vmem:[%s5343_s18 + $0xd0] sm:$0xff] }
 0x4be   : > { %v4314_v20 = vpop.f32.mrb[70].mxu0  ;;  %4668 = vmatprep.subr.bf16.mxu1 %v4667_v17 }
 0x4bf   : > { %v2317_v23 = vpop.f32.mrb[71].mxu0  ;;  %4670 = vmatpush3.bf16.msra.mxu1 %v4667_v17  ;;  %v4947_v17 = vld [vmem:[%s5343_s18 + $0xc8] sm:$0xff] }
 0x4c0   : > { %v4671_v62 = vpack.c.bf16 %v4314_v20, %v2317_v23  ;;  %v4948_v20 = vld [vmem:[%s5343_s18 + $0xd8] sm:$0xff]  ;;  %v4949_v23 = vld [vmem:[%s5343_s18 + $0xe0] sm:$0xff] }
 0x4c2   : > { %v4317_v25 = vpop.f32.mrb[72].mxu0  ;;  %4672 = vmatprep.subr.bf16.mxu1 %v4671_v62 }
 0x4c3   : > { %v2327_v27 = vpop.f32.mrb[73].mxu0  ;;  %4674 = vmatpush3.bf16.msra.mxu1 %v4671_v62  ;;  %v4950_v62 = vld [vmem:[%s5343_s18 + $0xe8] sm:$0xff] }
 0x4c4   : > { %v4675_v28 = vpack.c.bf16 %v4317_v25, %v2327_v27  ;;  %v4951_v25 = vld [vmem:[%s5343_s18 + $0xf0] sm:$0xff]  ;;  %v4952_v27 = vld [vmem:[%s5343_s18 + $0xf8] sm:$0xff]  ;;  %s401_s18 = sand.u32 1, %s5071_s14  }
 0x4c5   : > { %s3443_s20 = sshll.u32 %s401_s18, 8  ;;  %s6301_s17 = scalar_lea.sflag [#allocation4], %s401_s18 }
 0x4c6   : > { %v4320_v30 = vpop.f32.mrb[74].mxu0  ;;  %4368 = vmatmul.mubr.msk.f32.vlgmr.msra.gmra.mrb[64].mxu1 %vm807_vm1, %v4923_v32  ;;  %4676 = vmatprep.subr.bf16.mxu1 %v4675_v28  ;;  %v5834_v32 = vld [vmem:[%s6351_s9] ss:$0 sm:$0xff]  ;;  %s6163_s21 = scalar_lea.vmem [#allocation7], %s3443_s20 }
 0x4c7   : > { %v2337_v33 = vpop.f32.mrb[75].mxu0  ;;  %4678 = vmatpush3.bf16.msra.mxu1 %v4675_v28  ;;  %4370 = vmatprep.mubr.msk.f32.mxu1 %vm807_vm1, %v4924_v36  ;;  %v2905_v28 = vlaneseq  ;;  %s3339_s29 = sshll.u32 %s6163_s21, 4  ;;  %s6291_s29 = int_to_ptr.vmem [resolvable:$true] %s3339_s29 }
 0x4c8   : > { %v4679_v38 = vpack.c.bf16 %v4320_v30, %v2337_v33  ;;  %s5009_s24 = scalar_lea.vmem %s6291_s29, 4096  ;;  %p5016_p4 = scmp.lt.s32.totalorder %s6291_s29, %s5014_s28 }
 0x4c9   : > { %v5829_v30 = vand.u32 127, %v2905_v28  ;;  %p5010_p12 = scmp.ne.s32.totalorder %s6291_s29, %s5009_s24  ;;  %p5017_p7 = scmp.lt.s32.totalorder %s5015_s30, %s5009_s24 }
 0x4ca   : > { %v4323_v39 = vpop.f32.mrb[76].mxu0  ;;  %4371 = vmatmul.mubr.msk.f32.gmra.mrb[66].mxu1 %vm807_vm1, %v4925_v41  ;;  %4680 = vmatprep.subr.bf16.mxu1 %v4679_v38 }
 0x4cb   : > { %v2347_v43 = vpop.f32.mrb[77].mxu0  ;;  %4682 = vmatpush3.bf16.msra.mxu1 %v4679_v38  ;;  %4373 = vmatprep.mubr.msk.f32.mxu1 %vm807_vm1, %v4926_v44  ;;  %vm2907_vm2 = vcmp.lt.s32.totalorder %v5829_v30, 8  ;;  %p5011_p2 = pnand %p5010_p12, %p6373_p1  ;;  %p5018_p8 = por %p5017_p7, %p5016_p4 }
 0x4cc   : > { %v4683_v46 = vpack.c.bf16 %v4323_v39, %v2347_v43 }
 0x4cd   : > { %p5012_p3 = pneg %p5011_p2 }
 0x4ce   : > { %v4326_v48 = vpop.f32.mrb[78].mxu0  ;;  %4374 = vmatmul.mubr.msk.f32.gmra.mrb[68].mxu1 %vm807_vm1, %v4927_v4  ;;  %4684 = vmatprep.subr.bf16.mxu1 %v4683_v46 }
 0x4cf   : > { %v2357_v6 = vpop.f32.mrb[79].mxu0  ;;  %4686 = vmatpush3.bf16.msra.mxu1 %v4683_v46  ;;  %4376 = vmatprep.mubr.msk.f32.mxu1 %vm807_vm1, %v4928_v18  ;;  %p5019_p11 = pnand %p5018_p8, %p5012_p3 }
 0x4d0   : > { %v4687_v9 = vpack.c.bf16 %v4326_v48, %v2357_v6 }
 0x4d2   : > { %v4329_v11 = vpop.f32.mrb[80].mxu0  ;;  %4377 = vmatmul.mubr.msk.f32.gmra.mrb[70].mxu1 %vm807_vm1, %v4929_v49  ;;  %4688 = vmatprep.subr.bf16.mxu1 %v4687_v9 }
 0x4d3   : > { %v2367_v14 = vpop.f32.mrb[81].mxu0  ;;  %4690 = vmatpush3.bf16.msra.mxu1 %v4687_v9  ;;  %4395 = vmatprep.mubr.msk.f32.mxu1 %vm807_vm1, %v4930_v16 }
 0x4d4   : > { %v4691_v22 = vpack.c.bf16 %v4329_v11, %v2367_v14 }
 0x4d6   : > { %v4332_v19 = vpop.f32.mrb[82].mxu0  ;;  %4396 = vmatmul.mubr.msk.f32.vlgmr.msra.gmra.mrb[72].mxu1 %vm807_vm1, %v4931_v21  ;;  %4692 = vmatprep.subr.bf16.mxu1 %v4691_v22 }
 0x4d7   : > { %v2377_v51 = vpop.f32.mrb[83].mxu0  ;;  %4694 = vmatpush3.bf16.msra.mxu1 %v4691_v22  ;;  %4398 = vmatprep.mubr.msk.f32.mxu1 %vm807_vm1, %v4932_v24 }
 0x4d8   : > { %v4695_v26 = vpack.c.bf16 %v4332_v19, %v2377_v51 }
 0x4da   : > { %v4335_v53 = vpop.f32.mrb[84].mxu0  ;;  %4399 = vmatmul.mubr.msk.f32.gmra.mrb[74].mxu1 %vm807_vm1, %v4933_v29  ;;  %4696 = vmatprep.subr.bf16.mxu1 %v4695_v26 }
 0x4db   : > { %v2387_v31 = vpop.f32.mrb[85].mxu0  ;;  %4698 = vmatpush3.bf16.msra.mxu1 %v4695_v26  ;;  %4401 = vmatprep.mubr.msk.f32.mxu1 %vm807_vm1, %v4934_v54 }
 0x4dc   : > { %v4699_v34 = vpack.c.bf16 %v4335_v53, %v2387_v31 }
 0x4de   : > { %v4338_v37 = vpop.f32.mrb[86].mxu0  ;;  %4402 = vmatmul.mubr.msk.f32.gmra.mrb[76].mxu1 %vm807_vm1, %v4935_v56  ;;  %4700 = vmatprep.subr.bf16.mxu1 %v4699_v34 }
 0x4df   : > { %v2397_v40 = vpop.f32.mrb[87].mxu0  ;;  %4702 = vmatpush3.bf16.msra.mxu1 %v4699_v34  ;;  %4404 = vmatprep.mubr.msk.f32.mxu1 %vm807_vm1, %v4936_v42 }
 0x4e0   : > { %v4703_v58 = vpack.c.bf16 %v4338_v37, %v2397_v40 }
 0x4e2   : > { %v4341_v45 = vpop.f32.mrb[88].mxu0  ;;  %4405 = vmatmul.mubr.msk.f32.gmra.mrb[78].mxu1 %vm807_vm1, %v4937_v47  ;;  %4704 = vmatprep.subr.bf16.mxu1 %v4703_v58 }
 0x4e3   : > { %v2407_v50 = vpop.f32.mrb[89].mxu0  ;;  %4706 = vmatpush3.bf16.msra.mxu1 %v4703_v58  ;;  %4423 = vmatprep.mubr.msk.f32.mxu1 %vm807_vm1, %v4938_v52 }
 0x4e4   : > { %v4707_v55 = vpack.c.bf16 %v4341_v45, %v2407_v50 }
 0x4e6   : > { %v4344_v57 = vpop.f32.mrb[90].mxu0  ;;  %4424 = vmatmul.mubr.msk.f32.vlgmr.msra.gmra.mrb[80].mxu1 %vm807_vm1, %v4939_v60  ;;  %4708 = vmatprep.subr.bf16.mxu0 %v4707_v55 }
 0x4e7   : > { %4723 = vmatprep.subr.bf16.mxu1 %v4707_v55  ;;  %v2417_v63 = vpop.f32.mrb[91].mxu0  ;;  %4710 = vmatpush3.bf16.msra.mxu0 %v4707_v55 }
 0x4e8   : > { %v4711_v1 = vpack.c.bf16 %v4344_v57, %v2417_v63  ;;  %4727 = vmatpush3.bf16.msra.mxu1 %v4707_v55  ;;  %4426 = vmatprep.mubr.msk.f32.mxu1 %vm807_vm1, %v4940_v2 }
 0x4ea   : > { %v4347_v3 = vpop.f32.mrb[92].mxu0  ;;  %4427 = vmatmul.mubr.msk.f32.gmra.mrb[82].mxu1 %vm807_vm1, %v4941_v5  ;;  %4712 = vmatprep.subr.bf16.mxu0 %v4711_v1 }
 0x4eb   : > { %v2427_v7 = vpop.f32.mrb[93].mxu0  ;;  %4714 = vmatpush3.bf16.msra.mxu0 %v4711_v1  ;;  %4429 = vmatprep.mubr.msk.f32.mxu1 %vm807_vm1, %v4942_v59 }
 0x4ec   : > { %v4715_v61 = vpack.c.bf16 %v4347_v3, %v2427_v7  ;;  %4724 = vmatprep.subr.bf16.mxu1 %v4711_v1 }
 0x4ed   : > { %4728 = vmatpush3.bf16.msra.mxu1 %v4711_v1 }
 0x4ee   : > { %v4350_v8 = vpop.f32.mrb[94].mxu0  ;;  %4430 = vmatmul.mubr.msk.f32.gmra.mrb[84].mxu1 %vm807_vm1, %v4943_v10  ;;  %4716 = vmatprep.subr.bf16.mxu0 %v4715_v61 }
 0x4ef   : > { %v2437_v12 = vpop.f32.mrb[95].mxu0  ;;  %4718 = vmatpush3.bf16.msra.mxu0 %v4715_v61  ;;  %4432 = vmatprep.mubr.msk.f32.mxu1 %vm807_vm1, %v4944_v13 }
 0x4f0   : > { %v4719_v0 = vpack.c.bf16 %v4350_v8, %v2437_v12  ;;  %4725 = vmatprep.subr.bf16.mxu1 %v4715_v61 }
 0x4f1   : > { %4729 = vmatpush3.bf16.msra.mxu1 %v4715_v61 }
 0x4f2   : > { %4433 = vmatmul.mubr.msk.f32.gmra.mrb[86].mxu1 %vm807_vm1, %v4945_v15  ;;  %4720 = vmatprep.subr.bf16.mxu0 %v4719_v0 }
 0x4f3   : > { %4722 = vmatpush3.bf16.msra.mxu0 %v4719_v0  ;;  %4726 = vmatprep.subr.bf16.mxu1 %v4719_v0 }
 0x4f4   : > { %4454 = vmatprep.mubr.msk.f32.mxu1 %vm807_vm1, %v4946_v35 }
 0x4f5   : > { %4730 = vmatpush3.bf16.msra.mxu1 %v4719_v0 }
 0x4f6   : > { %4452 = vmatmul.mubr.msk.f32.vlgmr.msra.gmra.mrb[96].mxu0 %vm807_vm1, %v4947_v17 }
 0x4f8   : > { %4455 = vmatmul.mubr.msk.f32.vlgmr.msra.gmra.mrb[88].mxu1 %vm807_vm1, %v4948_v20 }
 0x4f9   : > { %4457 = vmatprep.mubr.msk.f32.mxu1 %vm807_vm1, %v4949_v23 }
 0x4fc   : > { %4458 = vmatmul.mubr.msk.f32.gmra.mrb[90].mxu1 %vm807_vm1, %v4950_v62 }
 0x4fd   : > { %4460 = vmatprep.mubr.msk.f32.mxu1 %vm807_vm1, %v4951_v25 }
 0x500   : > { %4461 = vmatmul.mubr.msk.f32.gmra.mrb[92].mxu1 %vm807_vm1, %v4952_v27 }
 0x599   : > { %v4369_v33 = vpop.f32.mrb[64].mxu1 }
 0x59a   : > { %v2874_v36 = vadd.f32 %v4369_v33, %v5834_v32  ;;  %v2512_v38 = vpop.f32.mrb[65].mxu1 }
 0x59b   : > { %v2873_v39 = vadd.f32 %v5834_v32, %v2512_v38 }
 0x59c   : > { %v5841_v41 = vsel %vm2907_vm2, %v2874_v36, -1e+30 }
 0x59d   : > { %2942 = vmax.xlane.f32.xlu0 %v5841_v41  ;;  %v4372_v43 = vpop.f32.mrb[66].mxu1  ;;  %v5848_v4 = vsel %vm2907_vm2, %v2873_v39, -1e+30 }
 0x59e   : > { %v2876_v44 = vadd.f32 %v4372_v43, %v5834_v32  ;;  %v2522_v46 = vpop.f32.mrb[67].mxu1 }
 0x59f   : > { %v2875_v48 = vadd.f32 %v5834_v32, %v2522_v46 }
 0x5a0   : > { %v5852_v6 = vsel %vm2907_vm2, %v2876_v44, -1e+30 }
 0x5a1   : > { %2940 = vmax.xlane.f32.xlu0 %v5848_v4  ;;  %2946 = vmax.xlane.f32.xlu1 %v5852_v6  ;;  %v4375_v18 = vpop.f32.mrb[68].mxu1  ;;  %v5860_v14 = vsel %vm2907_vm2, %v2875_v48, -1e+30 }
 0x5a2   : > { %v2878_v9 = vadd.f32 %v4375_v18, %v5834_v32  ;;  %v2532_v11 = vpop.f32.mrb[69].mxu1 }
 0x5a3   : > { %v2877_v49 = vadd.f32 %v5834_v32, %v2532_v11 }
 0x5a4   : > { %v5871_v51 = vsel %vm2907_vm2, %v2878_v9, -1e+30 }
 0x5a5   : > { %2944 = vmax.xlane.f32.xlu1 %v5860_v14  ;;  %v4378_v16 = vpop.f32.mrb[70].mxu1  ;;  %v5865_v22 = vsel %vm2907_vm2, %v2877_v49, -1e+30 }
 0x5a6   : > { %v2880_v19 = vadd.f32 %v4378_v16, %v5834_v32  ;;  %2948 = vmax.xlane.f32.xlu0 %v5865_v22  ;;  %v2542_v21 = vpop.f32.mrb[71].mxu1 }
 0x5a7   : > { %v2879_v24 = vadd.f32 %v5834_v32, %v2542_v21 }
 0x5a8   : > { %v5883_v54 = vsel %vm2907_vm2, %v2880_v19, -1e+30 }
 0x5a9   : > { %2950 = vmax.xlane.f32.xlu1 %v5871_v51  ;;  %v4397_v26 = vpop.f32.mrb[72].mxu1  ;;  %v5877_v53 = vsel %vm2907_vm2, %v2879_v24, -1e+30 }
 0x5aa   : > { %v2882_v29 = vadd.f32 %v4397_v26, %v5834_v32  ;;  %2952 = vmax.xlane.f32.xlu0 %v5877_v53  ;;  %v2617_v31 = vpop.f32.mrb[73].mxu1 }
 0x5ab   : > { %v2881_v34 = vadd.f32 %v5834_v32, %v2617_v31 }
 0x5ac   : > { %v5895_v58 = vsel %vm2907_vm2, %v2882_v29, -1e+30 }
 0x5ad   : > { %2954 = vmax.xlane.f32.xlu1 %v5883_v54  ;;  %v4400_v37 = vpop.f32.mrb[74].mxu1  ;;  %v5889_v56 = vsel %vm2907_vm2, %v2881_v34, -1e+30 }
 0x5ae   : > { %v2884_v40 = vadd.f32 %v4400_v37, %v5834_v32  ;;  %2956 = vmax.xlane.f32.xlu0 %v5889_v56  ;;  %v2627_v42 = vpop.f32.mrb[75].mxu1 }
 0x5af   : > { %v2883_v45 = vadd.f32 %v5834_v32, %v2627_v42 }
 0x5b0   : > { %v5907_v57 = vsel %vm2907_vm2, %v2884_v40, -1e+30 }
 0x5b1   : > { %2958 = vmax.xlane.f32.xlu1 %v5895_v58  ;;  %v4403_v47 = vpop.f32.mrb[76].mxu1  ;;  %v5901_v50 = vsel %vm2907_vm2, %v2883_v45, -1e+30 }
 0x5b2   : > { %v2886_v52 = vadd.f32 %v4403_v47, %v5834_v32  ;;  %2960 = vmax.xlane.f32.xlu0 %v5901_v50  ;;  %v2637_v55 = vpop.f32.mrb[77].mxu1 }
 0x5b3   : > { %v2885_v60 = vadd.f32 %v5834_v32, %v2637_v55 }
 0x5b4   : > { %v5919_v5 = vsel %vm2907_vm2, %v2886_v52, -1e+30 }
 0x5b5   : > { %2962 = vmax.xlane.f32.xlu1 %v5907_v57  ;;  %v4406_v63 = vpop.f32.mrb[78].mxu1  ;;  %v5913_v1 = vsel %vm2907_vm2, %v2885_v60, -1e+30 }
 0x5b6   : > { %v2888_v2 = vadd.f32 %v4406_v63, %v5834_v32  ;;  %2964 = vmax.xlane.f32.xlu0 %v5913_v1  ;;  %v2647_v3 = vpop.f32.mrb[79].mxu1 }
 0x5b7   : > { %v2887_v7 = vadd.f32 %v5834_v32, %v2647_v3 }
 0x5b8   : > { %v5931_v12 = vsel %vm2907_vm2, %v2888_v2, -1e+30 }
 0x5b9   : > { %2966 = vmax.xlane.f32.xlu1 %v5919_v5  ;;  %v4425_v59 = vpop.f32.mrb[80].mxu1  ;;  %v5925_v61 = vsel %vm2907_vm2, %v2887_v7, -1e+30 }
 0x5ba   : > { %v2890_v8 = vadd.f32 %v4425_v59, %v5834_v32  ;;  %2968 = vmax.xlane.f32.xlu0 %v5925_v61  ;;  %v2722_v10 = vpop.f32.mrb[81].mxu1 }
 0x5bb   : > { %v2889_v13 = vadd.f32 %v5834_v32, %v2722_v10 }
 0x5bc   : > { %v5943_v20 = vsel %vm2907_vm2, %v2890_v8, -1e+30 }
 0x5bd   : > { %2970 = vmax.xlane.f32.xlu1 %v5931_v12  ;;  %v4428_v0 = vpop.f32.mrb[82].mxu1  ;;  %v5937_v15 = vsel %vm2907_vm2, %v2889_v13, -1e+30 }
 0x5be   : > { %v2892_v35 = vadd.f32 %v4428_v0, %v5834_v32  ;;  %2972 = vmax.xlane.f32.xlu0 %v5937_v15  ;;  %v2732_v17 = vpop.f32.mrb[83].mxu1 }
 0x5bf   : > { %v2891_v23 = vadd.f32 %v5834_v32, %v2732_v17 }
 0x5c0   : > { %v5955_v33 = vsel %vm2907_vm2, %v2892_v35, -1e+30 }
 0x5c1   : > { %2974 = vmax.xlane.f32.xlu1 %v5943_v20  ;;  %v4431_v62 = vpop.f32.mrb[84].mxu1  ;;  %v5949_v25 = vsel %vm2907_vm2, %v2891_v23, -1e+30 }
 0x5c2   : > { %v2894_v27 = vadd.f32 %v4431_v62, %v5834_v32  ;;  %2976 = vmax.xlane.f32.xlu0 %v5949_v25  ;;  %v2742_v28 = vpop.f32.mrb[85].mxu1 }
 0x5c3   : > { %v2893_v36 = vadd.f32 %v5834_v32, %v2742_v28 }
 0x5c4   : > { %v5967_v46 = vsel %vm2907_vm2, %v2894_v27, -1e+30 }
 0x5c5   : > { %2978 = vmax.xlane.f32.xlu1 %v5955_v33  ;;  %v4434_v38 = vpop.f32.mrb[86].mxu1  ;;  %v5961_v39 = vsel %vm2907_vm2, %v2893_v36, -1e+30 }
 0x5c6   : > { %v2896_v43 = vadd.f32 %v4434_v38, %v5834_v32  ;;  %2980 = vmax.xlane.f32.xlu0 %v5961_v39  ;;  %v2752_v44 = vpop.f32.mrb[87].mxu1 }
 0x5c7   : > { %v2895_v48 = vadd.f32 %v5834_v32, %v2752_v44 }
 0x5c8   : > { %v5979_v16 = vsel %vm2907_vm2, %v2896_v43, -1e+30 }
 0x5c9   : > { %2982 = vmax.xlane.f32.xlu1 %v5967_v46  ;;  %v4453_v18 = vpop.f32.mrb[96].mxu0  ;;  %v5973_v9 = vsel %vm2907_vm2, %v2895_v48, -1e+30 }
 0x5ca   : > { %v2898_v11 = vadd.f32 %v4453_v18, %v5834_v32  ;;  %2984 = vmax.xlane.f32.xlu0 %v5973_v9  ;;  %v2827_v49 = vpop.f32.mrb[97].mxu0 }
 0x5cb   : > { %v2897_v19 = vadd.f32 %v5834_v32, %v2827_v49  ;;  %v4456_v21 = vpop.f32.mrb[88].mxu1 }
 0x5cc   : > { %v2837_v24 = vpop.f32.mrb[89].mxu1  ;;  %v2900_v31 = vadd.f32 %v4456_v21, %v5834_v32  ;;  %v5992_v34 = vsel %vm2907_vm2, %v2898_v11, -1e+30 }
 0x5cd   : > { %2986 = vmax.xlane.f32.xlu1 %v5979_v16  ;;  %v2899_v26 = vadd.f32 %v5834_v32, %v2837_v24  ;;  %v5986_v29 = vsel %vm2907_vm2, %v2897_v19, -1e+30 }
 0x5ce   : > { %2988 = vmax.xlane.f32.xlu0 %v5986_v29  ;;  %v6004_v52 = vsel %vm2907_vm2, %v2900_v31, -1e+30 }
 0x5cf   : > { %v4459_v37 = vpop.f32.mrb[90].mxu1  ;;  %v5996_v40 = vsel %vm2907_vm2, %v2899_v26, -1e+30 }
 0x5d0   : > { %v2847_v42 = vpop.f32.mrb[91].mxu1  ;;  %v2902_v47 = vadd.f32 %v4459_v37, %v5834_v32 }
 0x5d1   : > { %2990 = vmax.xlane.f32.xlu1 %v5992_v34  ;;  %v2901_v45 = vadd.f32 %v5834_v32, %v2847_v42 }
 0x5d2   : > { %2992 = vmax.xlane.f32.xlu0 %v5996_v40  ;;  %v6016_v7 = vsel %vm2907_vm2, %v2902_v47, -1e+30 }
 0x5d3   : > { %v4462_v55 = vpop.f32.mrb[92].mxu1  ;;  %v6008_v60 = vsel %vm2907_vm2, %v2901_v45, -1e+30 }
 0x5d4   : > { %v2904_v63 = vadd.f32 %v4462_v55, %v5834_v32  ;;  %v2857_v2 = vpop.f32.mrb[93].mxu1 }
 0x5d5   : > { %2994 = vmax.xlane.f32.xlu1 %v6004_v52  ;;  %v2903_v3 = vadd.f32 %v5834_v32, %v2857_v2 }
 0x5d6   : > { %2996 = vmax.xlane.f32.xlu0 %v6008_v60  ;;  %v6026_v8 = vsel %vm2907_vm2, %v2904_v63, -1e+30 }
 0x5d7   : > { %v6020_v59 = vsel %vm2907_vm2, %v2903_v3, -1e+30 }
 0x5d9   : > { %2998 = vmax.xlane.f32.xlu1 %v6016_v7 }
 0x5da   : > { %3000 = vmax.xlane.f32.xlu0 %v6020_v59 }
 0x5dd   : > { %3002 = vmax.xlane.f32.xlu1 %v6026_v8 }
 0x62a   : > { %v2943_v32 = vpop.xlane.xlu0 %2942 }
 0x62b   : > { %v6030_v10 = vsub.f32 %v5841_v41, %v2943_v32 }
 0x62d   : > { %v3038_v13 = vmul.f32 1.442695, %v6030_v10 }
 0x62e   : > { %v2941_v0 = vpop.xlane.xlu0 %2940  ;;  %v2947_v35 = vpop.xlane.xlu1 %2946 }
 0x62f   : > { %4795 = vpow2.f32 %v3038_v13  ;;  %v6034_v17 = vsub.f32 %v5848_v4, %v2941_v0  ;;  %v6037_v23 = vsub.f32 %v5852_v6, %v2947_v35 }
 0x631   : > { %v3036_v62 = vmul.f32 1.442695, %v6034_v17  ;;  %v3042_v27 = vmul.f32 1.442695, %v6037_v23 }
 0x632   : > { %v2945_v28 = vpop.xlane.xlu1 %2944 }
 0x633   : > { %4797 = vpow2.f32 %v3036_v62  ;;  %v6042_v41 = vsub.f32 %v5860_v14, %v2945_v28  ;;  %v2949_v36 = vpop.xlane.xlu0 %2948 }
 0x634   : > { %4799 = vpow2.f32 %v3042_v27  ;;  %v6045_v38 = vsub.f32 %v5865_v22, %v2949_v36 }
 0x635   : > { %v3040_v4 = vmul.f32 1.442695, %v6042_v41 }
 0x636   : > { %v3044_v43 = vmul.f32 1.442695, %v6045_v38  ;;  %v2951_v6 = vpop.xlane.xlu1 %2950 }
 0x637   : > { %4801 = vpow2.f32 %v3040_v4  ;;  %v6050_v44 = vsub.f32 %v5871_v51, %v2951_v6  ;;  %v2953_v48 = vpop.xlane.xlu0 %2952 }
 0x638   : > { %v6053_v18 = vsub.f32 %v5877_v53, %v2953_v48  ;;  %4803 = vpow2.f32 %v3044_v43 }
 0x639   : > { %v4796_v14 = vpop.eup %4795  ;;  %v3046_v11 = vmul.f32 1.442695, %v6050_v44 }
 0x63a   : > { %v3048_v22 = vmul.f32 1.442695, %v6053_v18  ;;  %v2955_v49 = vpop.xlane.xlu1 %2954  ;;  %3102 = vadd.xlane.f32.xlu1 %v4796_v14 }
 0x63b   : > { %4805 = vpow2.f32 %v3046_v11  ;;  %v6058_v19 = vsub.f32 %v5883_v54, %v2955_v49  ;;  %v2957_v21 = vpop.xlane.xlu0 %2956 }
 0x63c   : > { %v6061_v51 = vsub.f32 %v5889_v56, %v2957_v21  ;;  %4807 = vpow2.f32 %v3048_v22 }
 0x63d   : > { %v4798_v24 = vpop.eup %4797  ;;  %v3050_v53 = vmul.f32 1.442695, %v6058_v19 }
 0x63e   : > { %v4800_v26 = vpop.eup %4799  ;;  %v3052_v31 = vmul.f32 1.442695, %v6061_v51  ;;  %v2959_v37 = vpop.xlane.xlu1 %2958  ;;  %3100 = vadd.xlane.f32.xlu0 %v4798_v24 }
 0x63f   : > { %4809 = vpow2.f32 %v3050_v53  ;;  %v6066_v42 = vsub.f32 %v5895_v58, %v2959_v37  ;;  %3106 = vadd.xlane.f32.xlu1 %v4800_v26  ;;  %v2961_v54 = vpop.xlane.xlu0 %2960 }
 0x640   : > { %v6069_v45 = vsub.f32 %v5901_v50, %v2961_v54  ;;  %4811 = vpow2.f32 %v3052_v31 }
 0x641   : > { %v4802_v56 = vpop.eup %4801  ;;  %v3054_v47 = vmul.f32 1.442695, %v6066_v42 }
 0x642   : > { %v3056_v55 = vmul.f32 1.442695, %v6069_v45  ;;  %v2963_v63 = vpop.xlane.xlu1 %2962  ;;  %3104 = vadd.xlane.f32.xlu0 %v4802_v56  ;;  %v4804_v58 = vpop.eup %4803 }
 0x643   : > { %4813 = vpow2.f32 %v3054_v47  ;;  %v6074_v2 = vsub.f32 %v5907_v57, %v2963_v63  ;;  %v2965_v3 = vpop.xlane.xlu0 %2964 }
 0x644   : > { %v6077_v32 = vsub.f32 %v5913_v1, %v2965_v3  ;;  %4815 = vpow2.f32 %v3056_v55 }
 0x645   : > { %v4806_v13 = vpop.eup %4805  ;;  %v3058_v50 = vmul.f32 1.442695, %v6074_v2 }
 0x646   : > { %v3060_v0 = vmul.f32 1.442695, %v6077_v32  ;;  %v2967_v35 = vpop.xlane.xlu1 %2966  ;;  %3110 = vadd.xlane.f32.xlu1 %v4806_v13  ;;  %3108 = vadd.xlane.f32.xlu0 %v4804_v58  ;;  %v4808_v27 = vpop.eup %4807 }
 0x647   : > { %4817 = vpow2.f32 %v3058_v50  ;;  %v6082_v62 = vsub.f32 %v5919_v5, %v2967_v35  ;;  %v2969_v57 = vpop.xlane.xlu0 %2968 }
 0x648   : > { %v6085_v28 = vsub.f32 %v5925_v61, %v2969_v57  ;;  %4819 = vpow2.f32 %v3060_v0 }
 0x649   : > { %v4810_v1 = vpop.eup %4809  ;;  %v3062_v36 = vmul.f32 1.442695, %v6082_v62 }
 0x64a   : > { %v3064_v4 = vmul.f32 1.442695, %v6085_v28  ;;  %v2971_v43 = vpop.xlane.xlu1 %2970  ;;  %3114 = vadd.xlane.f32.xlu1 %v4810_v1  ;;  %3112 = vadd.xlane.f32.xlu0 %v4808_v27  ;;  %v4812_v48 = vpop.eup %4811 }
 0x64b   : > { %4821 = vpow2.f32 %v3062_v36  ;;  %v6090_v6 = vsub.f32 %v5931_v12, %v2971_v43  ;;  %v2973_v5 = vpop.xlane.xlu0 %2972 }
 0x64c   : > { %v6093_v14 = vsub.f32 %v5937_v15, %v2973_v5  ;;  %4823 = vpow2.f32 %v3064_v4 }
 0x64d   : > { %v4814_v61 = vpop.eup %4813  ;;  %v3066_v11 = vmul.f32 1.442695, %v6090_v6 }
 0x64e   : > { %v3068_v22 = vmul.f32 1.442695, %v6093_v14  ;;  %v2975_v49 = vpop.xlane.xlu1 %2974  ;;  %3118 = vadd.xlane.f32.xlu1 %v4814_v61  ;;  %3116 = vadd.xlane.f32.xlu0 %v4812_v48  ;;  %v4816_v24 = vpop.eup %4815 }
 0x64f   : > { %4825 = vpow2.f32 %v3066_v11  ;;  %v6098_v21 = vsub.f32 %v5943_v20, %v2975_v49  ;;  %v2977_v12 = vpop.xlane.xlu0 %2976 }
 0x650   : > { %v6101_v53 = vsub.f32 %v5949_v25, %v2977_v12  ;;  %4827 = vpow2.f32 %v3068_v22 }
 0x651   : > { %v4818_v15 = vpop.eup %4817  ;;  %v3070_v26 = vmul.f32 1.442695, %v6098_v21 }
 0x652   : > { %v3072_v31 = vmul.f32 1.442695, %v6101_v53  ;;  %v2979_v37 = vpop.xlane.xlu1 %2978  ;;  %3122 = vadd.xlane.f32.xlu1 %v4818_v15  ;;  %3120 = vadd.xlane.f32.xlu0 %v4816_v24  ;;  %v4820_v56 = vpop.eup %4819 }
 0x653   : > { %4829 = vpow2.f32 %v3070_v26  ;;  %v6106_v54 = vsub.f32 %v5955_v33, %v2979_v37  ;;  %v2981_v20 = vpop.xlane.xlu0 %2980 }
 0x654   : > { %v6109_v47 = vsub.f32 %v5961_v39, %v2981_v20  ;;  %4831 = vpow2.f32 %v3072_v31 }
 0x655   : > { %v4822_v25 = vpop.eup %4821  ;;  %v3074_v55 = vmul.f32 1.442695, %v6106_v54 }
 0x656   : > { %v3076_v63 = vmul.f32 1.442695, %v6109_v47  ;;  %v2983_v3 = vpop.xlane.xlu1 %2982  ;;  %3126 = vadd.xlane.f32.xlu1 %v4822_v25  ;;  %3124 = vadd.xlane.f32.xlu0 %v4820_v56  ;;  %v4824_v13 = vpop.eup %4823 }
 0x657   : > { %4833 = vpow2.f32 %v3074_v55  ;;  %v6114_v58 = vsub.f32 %v5967_v46, %v2983_v3  ;;  %v2985_v33 = vpop.xlane.xlu0 %2984 }
 0x658   : > { %v6117_v50 = vsub.f32 %v5973_v9, %v2985_v33  ;;  %4835 = vpow2.f32 %v3076_v63 }
 0x659   : > { %v4826_v39 = vpop.eup %4825  ;;  %v3078_v0 = vmul.f32 1.442695, %v6114_v58 }
 0x65a   : > { %v3080_v35 = vmul.f32 1.442695, %v6117_v50  ;;  %v2987_v57 = vpop.xlane.xlu1 %2986  ;;  %3130 = vadd.xlane.f32.xlu1 %v4826_v39  ;;  %3128 = vadd.xlane.f32.xlu0 %v4824_v13  ;;  %v4828_v1 = vpop.eup %4827 }
 0x65b   : > { %4837 = vpow2.f32 %v3078_v0  ;;  %v6122_v27 = vsub.f32 %v5979_v16, %v2987_v57  ;;  %v2989_v46 = vpop.xlane.xlu0 %2988 }
 0x65c   : > { %v6125_v36 = vsub.f32 %v5986_v29, %v2989_v46  ;;  %4839 = vpow2.f32 %v3080_v35 }
 0x65d   : > { %v4830_v9 = vpop.eup %4829  ;;  %v3082_v4 = vmul.f32 1.442695, %v6122_v27 }
 0x65e   : > { %v3084_v43 = vmul.f32 1.442695, %v6125_v36  ;;  %3134 = vadd.xlane.f32.xlu1 %v4830_v9  ;;  %v2991_v5 = vpop.xlane.xlu1 %2990  ;;  %3132 = vadd.xlane.f32.xlu0 %v4828_v1  ;;  %v4832_v61 = vpop.eup %4831 }
 0x65f   : > { %4841 = vpow2.f32 %v3082_v4  ;;  %v6130_v48 = vsub.f32 %v5992_v34, %v2991_v5  ;;  %v2993_v16 = vpop.xlane.xlu0 %2992 }
 0x660   : > { %v6133_v11 = vsub.f32 %v5996_v40, %v2993_v16  ;;  %4843 = vpow2.f32 %v3084_v43 }
 0x661   : > { %v4834_v29 = vpop.eup %4833  ;;  %v3086_v22 = vmul.f32 1.442695, %v6130_v48 }
 0x662   : > { %v3088_v49 = vmul.f32 1.442695, %v6133_v11  ;;  %3138 = vadd.xlane.f32.xlu1 %v4834_v29  ;;  %v2995_v12 = vpop.xlane.xlu1 %2994  ;;  %3136 = vadd.xlane.f32.xlu0 %v4832_v61  ;;  %v4836_v15 = vpop.eup %4835 }
 0x663   : > { %4845 = vpow2.f32 %v3086_v22  ;;  %v6138_v24 = vsub.f32 %v6004_v52, %v2995_v12  ;;  %v2997_v34 = vpop.xlane.xlu0 %2996 }
 0x664   : > { %v6141_v26 = vsub.f32 %v6008_v60, %v2997_v34  ;;  %4847 = vpow2.f32 %v3088_v49 }
 0x665   : > { %v4838_v40 = vpop.eup %4837  ;;  %v3090_v31 = vmul.f32 1.442695, %v6138_v24 }
 0x666   : > { %v3092_v37 = vmul.f32 1.442695, %v6141_v26  ;;  %3142 = vadd.xlane.f32.xlu1 %v4838_v40  ;;  %v2999_v20 = vpop.xlane.xlu1 %2998  ;;  %3140 = vadd.xlane.f32.xlu0 %v4836_v15  ;;  %v4840_v25 = vpop.eup %4839 }
 0x667   : > { %4849 = vpow2.f32 %v3090_v31  ;;  %v6146_v56 = vsub.f32 %v6016_v7, %v2999_v20  ;;  %v3001_v52 = vpop.xlane.xlu0 %3000 }
 0x668   : > { %v6149_v55 = vsub.f32 %v6020_v59, %v3001_v52  ;;  %4851 = vpow2.f32 %v3092_v37 }
 0x669   : > { %v4842_v60 = vpop.eup %4841  ;;  %v3094_v63 = vmul.f32 1.442695, %v6146_v56 }
 0x66a   : > { %v3096_v3 = vmul.f32 1.442695, %v6149_v55  ;;  %3146 = vadd.xlane.f32.xlu1 %v4842_v60  ;;  %v3003_v33 = vpop.xlane.xlu1 %3002  ;;  %3144 = vadd.xlane.f32.xlu0 %v4840_v25  ;;  %v4844_v7 = vpop.eup %4843 }
 0x66b   : > { %4853 = vpow2.f32 %v3094_v63  ;;  %v6154_v13 = vsub.f32 %v6026_v8, %v3003_v33 }
 0x66c   : > { %4855 = vpow2.f32 %v3096_v3 }
 0x66d   : > { %v4846_v39 = vpop.eup %4845  ;;  %v3098_v0 = vmul.f32 1.442695, %v6154_v13 }
 0x66e   : > { %3150 = vadd.xlane.f32.xlu1 %v4846_v39  ;;  %3148 = vadd.xlane.f32.xlu0 %v4844_v7  ;;  %v4848_v59 = vpop.eup %4847 }
 0x66f   : > { %4857 = vpow2.f32 %v3098_v0 }
 0x671   : > { %v4850_v35 = vpop.eup %4849 }
 0x672   : > { %3154 = vadd.xlane.f32.xlu1 %v4850_v35  ;;  %3152 = vadd.xlane.f32.xlu0 %v4848_v59  ;;  %v4852_v57 = vpop.eup %4851 }
 0x675   : > { %v4854_v46 = vpop.eup %4853 }
 0x676   : > { %3158 = vadd.xlane.f32.xlu1 %v4854_v46  ;;  %3156 = vadd.xlane.f32.xlu0 %v4852_v57  ;;  %v4856_v8 = vpop.eup %4855 }
 0x679   : > { %v4858_v1 = vpop.eup %4857 }
 0x67a   : > { %3162 = vadd.xlane.f32.xlu1 %v4858_v1  ;;  %3160 = vadd.xlane.f32.xlu0 %v4856_v8 }
 0x6c7   : > { %v3103_v9 = vpop.xlane.xlu1 %3102 }
 0x6c8   : > { %4859 = vlog2.f32 %v3103_v9 }
 0x6cb   : > { %v3101_v4 = vpop.xlane.xlu0 %3100 }
 0x6cc   : > { %v3107_v43 = vpop.xlane.xlu1 %3106  ;;  %4861 = vlog2.f32 %v3101_v4 }
 0x6cd   : > { %4863 = vlog2.f32 %v3107_v43 }
 0x6cf   : > { %v3105_v5 = vpop.xlane.xlu0 %3104 }
 0x6d0   : > { %4865 = vlog2.f32 %v3105_v5 }
 0x6d2   : > { %v4860_v16 = vpop.eup %4859 }
 0x6d3   : > { %v3167_v61 = vmul.f32 0.6931472, %v4860_v16  ;;  %v3111_v29 = vpop.xlane.xlu1 %3110  ;;  %v3109_v22 = vpop.xlane.xlu0 %3108 }
 0x6d4   : > { %4867 = vlog2.f32 %v3111_v29 }
 0x6d5   : > { %v3229_v49 = vsub.f32 %v6030_v10, %v3167_v61  ;;  %4869 = vlog2.f32 %v3109_v22 }
 0x6d6   : > { %v4862_v12 = vpop.eup %4861 }
 0x6d7   : > { %v4864_v34 = vpop.eup %4863  ;;  %v3261_v15 = vsel %vm2907_vm2, %v3229_v49, 0.0  ;;  %v3165_v40 = vmul.f32 0.6931472, %v4862_v12  ;;  %v3115_v31 = vpop.xlane.xlu1 %3114 }
 0x6d8   : > { %v3113_v37 = vpop.xlane.xlu0 %3112  ;;  %3293 = vst [vmem:[%s6163_s21 + $0x8] sm:$0xff] %v3261_v15  ;;  %v3171_v20 = vmul.f32 0.6931472, %v4864_v34  ;;  %4871 = vlog2.f32 %v3115_v31 }
 0x6d9   : > { %v3228_v52 = vsub.f32 %v6034_v17, %v3165_v40  ;;  %4873 = vlog2.f32 %v3113_v37 }
 0x6da   : > { %v4866_v10 = vpop.eup %4865  ;;  %v3231_v25 = vsub.f32 %v6037_v23, %v3171_v20 }
 0x6db   : > { %v3260_v60 = vsel %vm2907_vm2, %v3228_v52, 0.0  ;;  %v3169_v63 = vmul.f32 0.6931472, %v4866_v10  ;;  %v3119_v3 = vpop.xlane.xlu1 %3118 }
 0x6dc   : > { %v3117_v33 = vpop.xlane.xlu0 %3116  ;;  %v3263_v7 = vsel %vm2907_vm2, %v3231_v25, 0.0  ;;  %3292 = vst [vmem:[%s6163_s21] sm:$0xff] %v3260_v60  ;;  %4875 = vlog2.f32 %v3119_v3 }
 0x6dd   : > { %3295 = vst [vmem:[%s6163_s21 + $0x18] sm:$0xff] %v3263_v7  ;;  %v3230_v39 = vsub.f32 %v6042_v41, %v3169_v63  ;;  %4877 = vlog2.f32 %v3117_v33 }
 0x6de   : > { %v4868_v17 = vpop.eup %4867 }
 0x6df   : > { %v4870_v0 = vpop.eup %4869  ;;  %v3262_v23 = vsel %vm2907_vm2, %v3230_v39, 0.0  ;;  %v3175_v59 = vmul.f32 0.6931472, %v4868_v17  ;;  %v3123_v35 = vpop.xlane.xlu1 %3122 }
 0x6e0   : > { %v3121_v57 = vpop.xlane.xlu0 %3120  ;;  %3294 = vst [vmem:[%s6163_s21 + $0x10] sm:$0xff] %v3262_v23  ;;  %v3173_v46 = vmul.f32 0.6931472, %v4870_v0  ;;  %4879 = vlog2.f32 %v3123_v35 }
 0x6e1   : > { %v3233_v8 = vsub.f32 %v6050_v44, %v3175_v59  ;;  %4881 = vlog2.f32 %v3121_v57 }
 0x6e2   : > { %v4872_v1 = vpop.eup %4871  ;;  %v3232_v41 = vsub.f32 %v6045_v38, %v3173_v46 }
 0x6e3   : > { %v4874_v9 = vpop.eup %4873  ;;  %v3265_v4 = vsel %vm2907_vm2, %v3233_v8, 0.0  ;;  %v3179_v43 = vmul.f32 0.6931472, %v4872_v1  ;;  %v3127_v5 = vpop.xlane.xlu1 %3126 }
 0x6e4   : > { %v3125_v16 = vpop.xlane.xlu0 %3124  ;;  %3297 = vst [vmem:[%s6163_s21 + $0x28] sm:$0xff] %v3265_v4  ;;  %v3264_v61 = vsel %vm2907_vm2, %v3232_v41, 0.0  ;;  %v3177_v29 = vmul.f32 0.6931472, %v4874_v9  ;;  %4883 = vlog2.f32 %v3127_v5 }
 0x6e5   : > { %3296 = vst [vmem:[%s6163_s21 + $0x20] sm:$0xff] %v3264_v61  ;;  %v3235_v44 = vsub.f32 %v6058_v19, %v3179_v43  ;;  %4885 = vlog2.f32 %v3125_v16 }
 0x6e6   : > { %v4876_v38 = vpop.eup %4875  ;;  %v3234_v22 = vsub.f32 %v6053_v18, %v3177_v29 }
 0x6e7   : > { %v4878_v49 = vpop.eup %4877  ;;  %v3267_v12 = vsel %vm2907_vm2, %v3235_v44, 0.0  ;;  %v3183_v34 = vmul.f32 0.6931472, %v4876_v38  ;;  %v3131_v15 = vpop.xlane.xlu1 %3130 }
 0x6e8   : > { %v3129_v40 = vpop.xlane.xlu0 %3128  ;;  %3299 = vst [vmem:[%s6163_s21 + $0x38] sm:$0xff] %v3267_v12  ;;  %v3266_v31 = vsel %vm2907_vm2, %v3234_v22, 0.0  ;;  %v3181_v37 = vmul.f32 0.6931472, %v4878_v49  ;;  %4887 = vlog2.f32 %v3131_v15 }
 0x6e9   : > { %3298 = vst [vmem:[%s6163_s21 + $0x30] sm:$0xff] %v3266_v31  ;;  %v3237_v19 = vsub.f32 %v6066_v42, %v3183_v34  ;;  %4889 = vlog2.f32 %v3129_v40 }
 0x6ea   : > { %v4880_v18 = vpop.eup %4879  ;;  %v3236_v20 = vsub.f32 %v6061_v51, %v3181_v37 }
 0x6eb   : > { %v4882_v52 = vpop.eup %4881  ;;  %v3269_v10 = vsel %vm2907_vm2, %v3237_v19, 0.0  ;;  %v3187_v25 = vmul.f32 0.6931472, %v4880_v18  ;;  %v3135_v60 = vpop.xlane.xlu1 %3134 }
 0x6ec   : > { %v3133_v63 = vpop.xlane.xlu0 %3132  ;;  %3301 = vst [vmem:[%s6163_s21 + $0x48] sm:$0xff] %v3269_v10  ;;  %v3268_v3 = vsel %vm2907_vm2, %v3236_v20, 0.0  ;;  %v3185_v33 = vmul.f32 0.6931472, %v4882_v52  ;;  %4891 = vlog2.f32 %v3135_v60 }
 0x6ed   : > { %3300 = vst [vmem:[%s6163_s21 + $0x40] sm:$0xff] %v3268_v3  ;;  %v3239_v42 = vsub.f32 %v6074_v2, %v3187_v25  ;;  %4893 = vlog2.f32 %v3133_v63 }
 0x6ee   : > { %v4884_v51 = vpop.eup %4883  ;;  %v3238_v7 = vsub.f32 %v6069_v45, %v3185_v33 }
 0x6ef   : > { %v4886_v39 = vpop.eup %4885  ;;  %v3271_v17 = vsel %vm2907_vm2, %v3239_v42, 0.0  ;;  %v3191_v0 = vmul.f32 0.6931472, %v4884_v51  ;;  %v3139_v23 = vpop.xlane.xlu1 %3138 }
 0x6f0   : > { %v3137_v59 = vpop.xlane.xlu0 %3136  ;;  %3303 = vst [vmem:[%s6163_s21 + $0x58] sm:$0xff] %v3271_v17  ;;  %v3270_v35 = vsel %vm2907_vm2, %v3238_v7, 0.0  ;;  %v3189_v57 = vmul.f32 0.6931472, %v4886_v39  ;;  %4895 = vlog2.f32 %v3139_v23 }
 0x6f1   : > { %3302 = vst [vmem:[%s6163_s21 + $0x50] sm:$0xff] %v3270_v35  ;;  %v3241_v2 = vsub.f32 %v6082_v62, %v3191_v0  ;;  %4897 = vlog2.f32 %v3137_v59 }
 0x6f2   : > { %v4888_v45 = vpop.eup %4887  ;;  %v3240_v46 = vsub.f32 %v6077_v32, %v3189_v57 }
 0x6f3   : > { %v4890_v8 = vpop.eup %4889  ;;  %v3273_v1 = vsel %vm2907_vm2, %v3241_v2, 0.0  ;;  %v3195_v41 = vmul.f32 0.6931472, %v4888_v45  ;;  %v3143_v9 = vpop.xlane.xlu1 %3142 }
 0x6f4   : > { %v3141_v4 = vpop.xlane.xlu0 %3140  ;;  %3305 = vst [vmem:[%s6163_s21 + $0x68] sm:$0xff] %v3273_v1  ;;  %v3272_v43 = vsel %vm2907_vm2, %v3240_v46, 0.0  ;;  %v3193_v5 = vmul.f32 0.6931472, %v4890_v8  ;;  %4899 = vlog2.f32 %v3143_v9 }
 0x6f5   : > { %3304 = vst [vmem:[%s6163_s21 + $0x60] sm:$0xff] %v3272_v43  ;;  %v3243_v62 = vsub.f32 %v6090_v6, %v3195_v41  ;;  %4901 = vlog2.f32 %v3141_v4 }
 0x6f6   : > { %v4892_v32 = vpop.eup %4891  ;;  %v3242_v16 = vsub.f32 %v6085_v28, %v3193_v5 }
 0x6f7   : > { %v4894_v61 = vpop.eup %4893  ;;  %v3275_v29 = vsel %vm2907_vm2, %v3243_v62, 0.0  ;;  %v3199_v44 = vmul.f32 0.6931472, %v4892_v32  ;;  %v3147_v38 = vpop.xlane.xlu1 %3146 }
 0x6f8   : > { %v3145_v22 = vpop.xlane.xlu0 %3144  ;;  %3307 = vst [vmem:[%s6163_s21 + $0x78] sm:$0xff] %v3275_v29  ;;  %v3274_v49 = vsel %vm2907_vm2, %v3242_v16, 0.0  ;;  %v3197_v12 = vmul.f32 0.6931472, %v4894_v61  ;;  %4903 = vlog2.f32 %v3147_v38 }
 0x6f9   : > { %3306 = vst [vmem:[%s6163_s21 + $0x70] sm:$0xff] %v3274_v49  ;;  %v3245_v6 = vsub.f32 %v6098_v21, %v3199_v44  ;;  %4905 = vlog2.f32 %v3145_v22 }
 0x6fa   : > { %v4896_v28 = vpop.eup %4895  ;;  %v3244_v34 = vsub.f32 %v6093_v14, %v3197_v12 }
 0x6fb   : > { %v4898_v15 = vpop.eup %4897  ;;  %v3277_v40 = vsel %vm2907_vm2, %v3245_v6, 0.0  ;;  %v3203_v31 = vmul.f32 0.6931472, %v4896_v28  ;;  %v3151_v37 = vpop.xlane.xlu1 %3150 }
 0x6fc   : > { %v3149_v19 = vpop.xlane.xlu0 %3148  ;;  %3309 = vst [vmem:[%s6163_s21 + $0x88] sm:$0xff] %v3277_v40  ;;  %v3276_v18 = vsel %vm2907_vm2, %v3244_v34, 0.0  ;;  %v3201_v20 = vmul.f32 0.6931472, %v4898_v15  ;;  %4907 = vlog2.f32 %v3151_v37 }
 0x6fd   : > { %3308 = vst [vmem:[%s6163_s21 + $0x80] sm:$0xff] %v3276_v18  ;;  %v3247_v21 = vsub.f32 %v6106_v54, %v3203_v31  ;;  %4909 = vlog2.f32 %v3149_v19 }
 0x6fe   : > { %v4900_v14 = vpop.eup %4899  ;;  %v3246_v52 = vsub.f32 %v6101_v53, %v3201_v20 }
 0x6ff   : > { %v4902_v10 = vpop.eup %4901  ;;  %v3279_v25 = vsel %vm2907_vm2, %v3247_v21, 0.0  ;;  %v3207_v60 = vmul.f32 0.6931472, %v4900_v14  ;;  %v3155_v63 = vpop.xlane.xlu1 %3154 }
 0x700   : > { %v3153_v3 = vpop.xlane.xlu0 %3152  ;;  %3311 = vst [vmem:[%s6163_s21 + $0x98] sm:$0xff] %v3279_v25  ;;  %v3278_v33 = vsel %vm2907_vm2, %v3246_v52, 0.0  ;;  %v3205_v42 = vmul.f32 0.6931472, %v4902_v10  ;;  %4911 = vlog2.f32 %v3155_v63 }
 0x701   : > { %3310 = vst [vmem:[%s6163_s21 + $0x90] sm:$0xff] %v3278_v33  ;;  %v3249_v54 = vsub.f32 %v6114_v58, %v3207_v60  ;;  %4913 = vlog2.f32 %v3153_v3 }
 0x702   : > { %v4904_v53 = vpop.eup %4903  ;;  %v3248_v51 = vsub.f32 %v6109_v47, %v3205_v42 }
 0x703   : > { %v4906_v7 = vpop.eup %4905  ;;  %v3281_v39 = vsel %vm2907_vm2, %v3249_v54, 0.0  ;;  %v3211_v17 = vmul.f32 0.6931472, %v4904_v53  ;;  %v3159_v0 = vpop.xlane.xlu1 %3158 }
 0x704   : > { %v3157_v23 = vpop.xlane.xlu0 %3156  ;;  %3313 = vst [vmem:[%s6163_s21 + $0xa8] sm:$0xff] %v3281_v39  ;;  %v3280_v59 = vsel %vm2907_vm2, %v3248_v51, 0.0  ;;  %v3209_v35 = vmul.f32 0.6931472, %v4906_v7  ;;  %4915 = vlog2.f32 %v3159_v0 }
 0x705   : > { %3312 = vst [vmem:[%s6163_s21 + $0xa0] sm:$0xff] %v3280_v59  ;;  %v3251_v58 = vsub.f32 %v6122_v27, %v3211_v17  ;;  %4917 = vlog2.f32 %v3157_v23 }
 0x706   : > { %v4908_v47 = vpop.eup %4907  ;;  %v3250_v57 = vsub.f32 %v6117_v50, %v3209_v35 }
 0x707   : > { %v4910_v2 = vpop.eup %4909  ;;  %v3283_v45 = vsel %vm2907_vm2, %v3251_v58, 0.0  ;;  %v3215_v46 = vmul.f32 0.6931472, %v4908_v47  ;;  %v3163_v8 = vpop.xlane.xlu1 %3162 }
 0x708   : > { %v3161_v1 = vpop.xlane.xlu0 %3160  ;;  %3315 = vst [vmem:[%s6163_s21 + $0xb8] sm:$0xff] %v3283_v45  ;;  %v3282_v41 = vsel %vm2907_vm2, %v3250_v57, 0.0  ;;  %v3213_v9 = vmul.f32 0.6931472, %v4910_v2  ;;  %4919 = vlog2.f32 %v3163_v8 }
 0x709   : > { %3314 = vst [vmem:[%s6163_s21 + $0xb0] sm:$0xff] %v3282_v41  ;;  %v3253_v27 = vsub.f32 %v6130_v48, %v3215_v46  ;;  %4921 = vlog2.f32 %v3161_v1 }
 0x70a   : > { %v4912_v50 = vpop.eup %4911  ;;  %v3252_v4 = vsub.f32 %v6125_v36, %v3213_v9 }
 0x70b   : > { %v4914_v43 = vpop.eup %4913  ;;  %v3285_v5 = vsel %vm2907_vm2, %v3253_v27, 0.0  ;;  %v3219_v62 = vmul.f32 0.6931472, %v4912_v50 }
 0x70c   : > { %3317 = vst [vmem:[%s6163_s21 + $0xc8] sm:$0xff] %v3285_v5  ;;  %v3284_v32 = vsel %vm2907_vm2, %v3252_v4, 0.0  ;;  %v3217_v16 = vmul.f32 0.6931472, %v4914_v43 }
 0x70d   : > { %3316 = vst [vmem:[%s6163_s21 + $0xc0] sm:$0xff] %v3284_v32  ;;  %v3255_v61 = vsub.f32 %v6138_v24, %v3219_v62 }
 0x70e   : > { %v4916_v48 = vpop.eup %4915  ;;  %v3254_v29 = vsub.f32 %v6133_v11, %v3217_v16 }
 0x70f   : > { %v4918_v36 = vpop.eup %4917  ;;  %v3287_v44 = vsel %vm2907_vm2, %v3255_v61, 0.0  ;;  %v3223_v38 = vmul.f32 0.6931472, %v4916_v48 }
 0x710   : > { %3319 = vst [vmem:[%s6163_s21 + $0xd8] sm:$0xff] %v3287_v44  ;;  %v3286_v22 = vsel %vm2907_vm2, %v3254_v29, 0.0  ;;  %v3221_v49 = vmul.f32 0.6931472, %v4918_v36 }
 0x711   : > { %3318 = vst [vmem:[%s6163_s21 + $0xd0] sm:$0xff] %v3286_v22  ;;  %v3257_v24 = vsub.f32 %v6146_v56, %v3223_v38 }
 0x712   : > { %v4920_v12 = vpop.eup %4919  ;;  %v3256_v6 = vsub.f32 %v6141_v26, %v3221_v49 }
 0x713   : > { %v4922_v11 = vpop.eup %4921  ;;  %v3289_v28 = vsel %vm2907_vm2, %v3257_v24, 0.0  ;;  %v3227_v34 = vmul.f32 0.6931472, %v4920_v12 }
 0x714   : > { %3321 = vst [vmem:[%s6163_s21 + $0xe8] sm:$0xff] %v3289_v28  ;;  %v3288_v15 = vsel %vm2907_vm2, %v3256_v6, 0.0  ;;  %v3225_v40 = vmul.f32 0.6931472, %v4922_v11 }
 0x715   : > { %3320 = vst [vmem:[%s6163_s21 + $0xe0] sm:$0xff] %v3288_v15  ;;  %v3259_v56 = vsub.f32 %v6154_v13, %v3227_v34 }
 0x716   : > { %v3258_v26 = vsub.f32 %v6149_v55, %v3225_v40 }
 0x717   : > { %v3291_v31 = vsel %vm2907_vm2, %v3259_v56, 0.0 }
 0x718   : > { %3323 = vst [vmem:[%s6163_s21 + $0xf8] sm:$0xff] %v3291_v31  ;;  %v3290_v37 = vsel %vm2907_vm2, %v3258_v26, 0.0 }
 0x719   : > { %3322 = vst [vmem:[%s6163_s21 + $0xf0] sm:$0xff] %v3290_v37 }
 0x71a   : > { %5022 = shalt.err (!%p5019_p11)
}
 0x71b   : > { %s5023_s11 = scalar_lea.hbm %s6289_s19, 4096  ;;  %s5027_s18 = scalar_lea.hbm %s6352_s10, 8192 }
 0x71c   : > { %p5024_p13 = scmp.ne.s32.totalorder %s6289_s19, %s5023_s11  ;;  %p5028_p6 = scmp.lt.u32.totalorder %s6289_s19, %s6352_s10 }
 0x71d   : > { %p5029_p9 = scmp.lt.u32.totalorder %s5027_s18, %s5023_s11  ;;  %p5031_p12 = scmp.lt.u32.totalorder %s5023_s11, %s6289_s19 }
 0x71e   : > { %p5025_p5 = pnand %p5024_p13, %p6373_p1 }
 0x71f   : > { %p5030_p10 = por %p5029_p9, %p5028_p6 }
 0x720   : > { %p5026_p0 = pneg %p5025_p5 }
 0x721   : > { %p5032_p2 = por %p5031_p12, %p5030_p10 }
 0x723   : > { %p5033_p3 = pnand %p5032_p2, %p5026_p0 }
 0x725   : > { %5036 = shalt.err (!%p5033_p3)
}
 0x726   : > { %s5086_s26 = smov 128   ;;  %s5087_s27 = smov 8  }
 0x727   : > { %4739 = dma.vmem_to_hbm [thread:$0]  (%p6373_p1), %s6291_s29, 4096, %s6289_s19, %s6301_s17, %s5086_s26, %s5086_s26, %s5087_s27  }
 0x728 PF: > { %s6374_s15 = sld [smem:[#allocation14_spill]]  ;;  %p4756_p4 = scmp.ge.s32.totalorder %s5079_s16, 2 }
 0x729   : > { %s3354_s24 = sand.u32 1, %s5067_s13  }
 0x72a   : > { %s3355_s25 = scalar_lea.sflag [#allocation4], %s3354_s24 }
 0x72e   : > { %p6375_p7 = scmp.ne.s32.totalorder %s6374_s15, 0 }
 0x730   : > { %p4749_p8 = pnand %p4756_p4, %p6375_p7 }
 0x732   : > { %5062 = dma.done.wait (!%p4749_p8), %s3355_s25, 4096  }
 0x733   : > { %5064 = vsyncadd (!%p4749_p8), %s3355_s25, 4294963200  ;;  %s6376_s16 = sld [smem:[#allocation12_spill]]  ;;  %s6377_s28 = sld [smem:[#allocation11_spill]] }
 0x734   : > { %s6378_s15 = sld [smem:[#allocation13_spill]]  ;;  %s6379_s13 = smov %s5071_s14 }
 0x739   : > { %p22_p11 = scmp.ge.s32.totalorder %s6376_s16, 4   ;;  %s6380_s14 = smov %s6377_s28 }
 0x73b   :  { %24 = sbr.rel (!%p22_p11) target bundleno = 5 (0x5), region = 107 }
 0x742   :  { %3360 = vsyncpa [#allocation3], 1 }
 0x743   :  { %3362 = vsyncpa [#allocation3 + $0x1], 1 }
 0x744   :  { %3363 = vsyncpa [#allocation6], 1 }
 0x745   :  { %3364 = vsyncpa [#allocation4], 1 }
 0x746   :  { %3366 = vsyncpa [#allocation4 + $0x1], 1 }

</bundles_post_ra>
